<compile_context>
chip_gen: v7x
topology: tpu7x:2x2x1
jax: 0.10.0
libtpu: 0.0.40
codegen_flags: <defaults>
</compile_context>

<pallas_src>
import functools
import math

import jax
import jax.numpy as jnp
from jax.experimental import pallas as pl
from jax.experimental.pallas import tpu as pltpu


# 48 MiB: above v5e's 16 MiB / v6e's 32 MiB scoped defaults, below v7x's 64 MiB per-TC VMEM.
VMEM_LIMIT_BYTES = 48 * 1024 * 1024


def _mosaic(dims):
    return pltpu.CompilerParams(dimension_semantics=dims,
                                vmem_limit_bytes=VMEM_LIMIT_BYTES)


# --------------------------------------------------------------------------- tile helper

def _tile(dim, pref, align):
    """Largest `align`-multiple divisor of `dim` that is <= pref (or the full dim)."""
    if dim <= pref:
        return dim
    t = (pref // align) * align
    while t >= align:
        if dim % t == 0:
            return t
        t -= align
    return dim


# --------------------------------------------------------------------------- matmul kernels

def _linear_kernel(x_ref, w_ref, b_ref, o_ref, acc_ref, *, activation):
    """Tiled matmul with K-reduction accumulator; bias (+ GELU) fused in the epilogue."""
    @pl.when(pl.program_id(2) == 0)
    def _():
        acc_ref[...] = jnp.zeros_like(acc_ref)

    acc_ref[...] += jnp.dot(x_ref[...], w_ref[...],
                            preferred_element_type=jnp.float32)

    @pl.when(pl.program_id(2) == pl.num_programs(2) - 1)
    def _():
        acc = acc_ref[...] + b_ref[...]
        if activation == "gelu":
            # TODO(synk): HF BERT uses exact erf-GELU; tanh approximation is used here.
            acc = 0.5 * acc * (1.0 + jnp.tanh(
                0.7978845608028654 * (acc + 0.044715 * acc * acc * acc)))
        o_ref[...] = acc.astype(o_ref.dtype)


def linear(x, w, b, activation=None, out_dtype=jnp.bfloat16,
           tm=512, tn=512, tk=1024):
    """x:(M,K) bf16 @ w:(K,N) bf16 + b:(N,) f32 -> (M,N).  No casts; weights pre-cast."""
    M, K = x.shape
    _, N = w.shape
    tm = _tile(M, tm, 16)      # bf16 sublane packing: 16 rows per vreg
    tn = _tile(N, tn, 128)
    tk = _tile(K, tk, 128)     # tk=1024 pref -> full K (=768) for hidden contractions
    return pl.pallas_call(
        functools.partial(_linear_kernel, activation=activation),
        out_shape=jax.ShapeDtypeStruct((M, N), out_dtype),
        grid=(M // tm, N // tn, K // tk),
        in_specs=[
            pl.BlockSpec((tm, tk), lambda i, j, k: (i, k)),
            pl.BlockSpec((tk, tn), lambda i, j, k: (k, j)),
            pl.BlockSpec((1, tn), lambda i, j, k: (0, j)),
        ],
        out_specs=pl.BlockSpec((tm, tn), lambda i, j, k: (i, j)),
        scratch_shapes=[pltpu.VMEM((tm, tn), jnp.float32)],
        compiler_params=_mosaic(("parallel", "parallel", "arbitrary")),
    )(x, w, b.reshape(1, N))


def _linear_res_ln_kernel(x_ref, w_ref, b_ref, res_ref, g_ref, beta_ref,
                          o_ref, acc_ref, *, eps):
    """Matmul + bias + residual-add + LayerNorm, fused.  N (= hidden) kept whole so the
    row statistics can be computed in the epilogue."""
    @pl.when(pl.program_id(1) == 0)
    def _():
        acc_ref[...] = jnp.zeros_like(acc_ref)

    acc_ref[...] += jnp.dot(x_ref[...], w_ref[...],
                            preferred_element_type=jnp.float32)

    @pl.when(pl.program_id(1) == pl.num_programs(1) - 1)
    def _():
        acc = acc_ref[...] + b_ref[...] + res_ref[...].astype(jnp.float32)
        mean = jnp.mean(acc, axis=-1, keepdims=True)
        xc = acc - mean
        var = jnp.mean(xc * xc, axis=-1, keepdims=True)
        inv = jax.lax.rsqrt(var + eps)
        o_ref[...] = (xc * inv * g_ref[...] + beta_ref[...]).astype(o_ref.dtype)


def linear_res_ln(x, w, b, res, g, beta, eps, tm=512, tk=1024):
    """LayerNorm(x @ w + b + res) over the last axis; bf16 output (residual stream)."""
    M, K = x.shape
    _, N = w.shape
    tm = _tile(M, tm, 16)
    tk = _tile(K, tk, 128)
    return pl.pallas_call(
        functools.partial(_linear_res_ln_kernel, eps=eps),
        out_shape=jax.ShapeDtypeStruct((M, N), jnp.bfloat16),
        grid=(M // tm, K // tk),
        in_specs=[
            pl.BlockSpec((tm, tk), lambda i, k: (i, k)),
            pl.BlockSpec((tk, N), lambda i, k: (k, 0)),
            pl.BlockSpec((1, N), lambda i, k: (0, 0)),
            pl.BlockSpec((tm, N), lambda i, k: (i, 0)),   # residual: resident over K
            pl.BlockSpec((1, N), lambda i, k: (0, 0)),
            pl.BlockSpec((1, N), lambda i, k: (0, 0)),
        ],
        out_specs=pl.BlockSpec((tm, N), lambda i, k: (i, 0)),
        scratch_shapes=[pltpu.VMEM((tm, N), jnp.float32)],
        compiler_params=_mosaic(("parallel", "arbitrary")),
    )(x, w, b.reshape(1, N), res, g.reshape(1, N), beta.reshape(1, N))


# --------------------------------------------------------------------------- layernorm

def _layernorm_kernel(x_ref, g_ref, b_ref, o_ref, *, eps):
    x = x_ref[...].astype(jnp.float32)
    mean = jnp.mean(x, axis=-1, keepdims=True)
    xc = x - mean
    var = jnp.mean(xc * xc, axis=-1, keepdims=True)
    inv = jax.lax.rsqrt(var + eps)
    o_ref[...] = (xc * inv * g_ref[...] + b_ref[...]).astype(o_ref.dtype)


def layernorm(x, g, b, eps=1e-12, out_dtype=jnp.bfloat16, tm=512):
    """Row-tiled standalone LayerNorm (embedding LN); emits the bf16 residual stream."""
    M, H = x.shape
    tm = _tile(M, tm, 8)
    return pl.pallas_call(
        functools.partial(_layernorm_kernel, eps=eps),
        out_shape=jax.ShapeDtypeStruct((M, H), out_dtype),
        grid=(M // tm,),
        in_specs=[
            pl.BlockSpec((tm, H), lambda i: (i, 0)),
            pl.BlockSpec((1, H), lambda i: (0, 0)),
            pl.BlockSpec((1, H), lambda i: (0, 0)),
        ],
        out_specs=pl.BlockSpec((tm, H), lambda i: (i, 0)),
        compiler_params=_mosaic(("parallel",)),
    )(x, g.reshape(1, H), b.reshape(1, H))


# --------------------------------------------------------------------------- attention

def _attention_kernel(q_ref, k_ref, v_ref, m_ref, o_ref, *, heads_per_group, head_dim):
    """One (batch, head-group, query-tile) step.  The 1/sqrt(Dh) scale is pre-folded into
    the Q projection weights, so scores are just QK^T + mask."""
    m = m_ref[0]                                   # (1, S) f32 additive mask
    q = q_ref[0]                                   # (Tq, G) bf16, G = heads_per_group*Dh
    k = k_ref[0]                                   # (S,  G) bf16
    v = v_ref[0]                                   # (S,  G) bf16
    ctx = []
    for h in range(heads_per_group):               # tiny static unroll (2-4 heads/group)
        sl = slice(h * head_dim, (h + 1) * head_dim)
        # q @ k^T via transposed contraction (MXU consumes k directly, no XLU transpose)
        s = jax.lax.dot_general(q[:, sl], k[:, sl], (((1,), (1,)), ((), ())),
                                preferred_element_type=jnp.float32)
        s = s + m                                  # mask broadcast over query rows
        s = s - jnp.max(s, axis=-1, keepdims=True)
        p = jnp.exp(s)
        p = p * pl.reciprocal(jnp.sum(p, axis=-1, keepdims=True), approx=True)
        ctx.append(jnp.dot(p.astype(v.dtype), v[:, sl],
                           preferred_element_type=jnp.float32))
    # single lane-dense (Tq, G) store; G is a multiple of 128 -> unmasked vst
    o_ref[0] = jnp.concatenate(ctx, axis=-1).astype(o_ref.dtype)


def _heads_per_group(num_heads, head_dim):
    """Smallest head-group whose column width is a 128-lane multiple (e.g. 2 for BERT-base)."""
    for hg in range(1, num_heads + 1):
        if num_heads % hg == 0 and (hg * head_dim) % 128 == 0:
            return hg
    return num_heads


def attention(qkv, mask_add, num_heads):
    """qkv: (B, S, 3H) bf16 packed [Q|K|V]; mask_add: (B, 1, S) f32 -> (B, S, H) bf16."""
    B, S, H3 = qkv.shape
    H = H3 // 3
    Dh = H // num_heads
    hg = _heads_per_group(num_heads, Dh)
    G = hg * Dh                      # 128-lane aligned column-group width
    nhg = H // G                     # head groups (Q/K/V column-block offsets)
    Tq = _tile(S, 256, 16)           # flash-style query tiling for long S
    return pl.pallas_call(
        functools.partial(_attention_kernel, heads_per_group=hg, head_dim=Dh),
        out_shape=jax.ShapeDtypeStruct((B, S, H), jnp.bfloat16),
        grid=(B, nhg, S // Tq),
        in_specs=[
            pl.BlockSpec((1, Tq, G), lambda b, g, qt: (b, qt, g)),          # Q columns
            pl.BlockSpec((1, S, G), lambda b, g, qt: (b, 0, nhg + g)),      # K columns
            pl.BlockSpec((1, S, G), lambda b, g, qt: (b, 0, 2 * nhg + g)),  # V columns
            pl.BlockSpec((1, 1, S), lambda b, g, qt: (b, 0, 0)),            # per-batch mask
        ],
        out_specs=pl.BlockSpec((1, Tq, G), lambda b, g, qt: (b, qt, g)),
        compiler_params=_mosaic(("parallel", "parallel", "parallel")),
    )(qkv, qkv, qkv, mask_add)


# --------------------------------------------------------------------------- model

CONFIG = dict(hidden=128, heads=4, intermediate=512, layers=2,
              vocab=1000, max_pos=64, type_vocab=2, eps=1e-12)


def init_params(key, cfg):
    """Reference f32 parameters (randomly initialized stand-in for bert-base-uncased)."""
    H, I = cfg["hidden"], cfg["intermediate"]

    def nrm(k, shape):
        return 0.02 * jax.random.normal(k, shape, dtype=jnp.float32)

    keys = iter(jax.random.split(key, 8 + cfg["layers"] * 8))
    p = {
        "word_emb": nrm(next(keys), (cfg["vocab"], H)),
        "pos_emb": nrm(next(keys), (cfg["max_pos"], H)),
        "type_emb": nrm(next(keys), (cfg["type_vocab"], H)),
        "emb_ln_g": jnp.ones((H,), jnp.float32),
        "emb_ln_b": jnp.zeros((H,), jnp.float32),
        # head of BERTModel_two: nn.Linear(hidden, 1)
        "cls_w": nrm(next(keys), (H, 1)),
        "cls_b": jnp.zeros((1,), jnp.float32),
        "layers": [],
    }
    for _ in range(cfg["layers"]):
        p["layers"].append({
            "qkv_w": nrm(next(keys), (H, 3 * H)),           # fused Q/K/V projection
            "qkv_b": jnp.zeros((3 * H,), jnp.float32),
            "ao_w": nrm(next(keys), (H, H)), "ao_b": jnp.zeros((H,), jnp.float32),
            "ln1_g": jnp.ones((H,), jnp.float32), "ln1_b": jnp.zeros((H,), jnp.float32),
            "i_w": nrm(next(keys), (H, I)), "i_b": jnp.zeros((I,), jnp.float32),
            "o_w": nrm(next(keys), (I, H)), "o_b": jnp.zeros((H,), jnp.float32),
            "ln2_g": jnp.ones((H,), jnp.float32), "ln2_b": jnp.zeros((H,), jnp.float32),
        })
    return p


def prepare_params(p, cfg):
    """Kernel-ready params: matmul weights pre-cast to bf16 ONCE, and the 1/sqrt(Dh)
    attention scale folded into the Q columns of the fused QKV projection."""
    H, nh = cfg["hidden"], cfg["heads"]
    scale = 1.0 / math.sqrt(H // nh)
    out = {k: p[k] for k in ("word_emb", "pos_emb", "type_emb",
                             "emb_ln_g", "emb_ln_b", "cls_w", "cls_b")}
    out["layers"] = []
    for lp in p["layers"]:
        qkv_w = lp["qkv_w"].at[:, :H].multiply(scale)       # fold scale (f32), then cast
        qkv_b = lp["qkv_b"].at[:H].multiply(scale)
        out["layers"].append({
            "qkv_w": qkv_w.astype(jnp.bfloat16), "qkv_b": qkv_b,
            "ao_w": lp["ao_w"].astype(jnp.bfloat16), "ao_b": lp["ao_b"],
            "ln1_g": lp["ln1_g"], "ln1_b": lp["ln1_b"],
            "i_w": lp["i_w"].astype(jnp.bfloat16), "i_b": lp["i_b"],
            "o_w": lp["o_w"].astype(jnp.bfloat16), "o_b": lp["o_b"],
            "ln2_g": lp["ln2_g"], "ln2_b": lp["ln2_b"],
        })
    return out


def bert_layer(x2, lp, mask_add, B, S, num_heads, eps):
    """x2: (B*S, H) bf16 residual stream -> (B*S, H) bf16."""
    H = x2.shape[1]

    # fused Q/K/V projection; bf16 output feeds the attention MXU directly
    qkv = linear(x2, lp["qkv_w"], lp["qkv_b"])                            # (B*S, 3H)

    ctx = attention(qkv.reshape(B, S, 3 * H), mask_add, num_heads)        # (B, S, H)
    ctx2 = ctx.reshape(B * S, H)

    # attention output projection + residual + LayerNorm fused into one kernel
    attn_out = linear_res_ln(ctx2, lp["ao_w"], lp["ao_b"],
                             x2, lp["ln1_g"], lp["ln1_b"], eps)

    # FFN: GELU fused in the first matmul, residual + LayerNorm fused in the second
    inter = linear(attn_out, lp["i_w"], lp["i_b"], activation="gelu")
    return linear_res_ln(inter, lp["o_w"], lp["o_b"],
                         attn_out, lp["ln2_g"], lp["ln2_b"], eps)


def bert_model_two(params, source, mask, type_ids, cfg=CONFIG):
    """forward(source, mask, type) -> (B, 1), matching the PyTorch module."""
    B, S = source.shape
    H, nh, eps = cfg["hidden"], cfg["heads"], cfg["eps"]

    # --- embeddings (gathers are plain-JAX glue; LayerNorm runs row-tiled in Pallas) ---
    we = params["word_emb"][source]                        # (B, S, H)
    pe = params["pos_emb"][:S][None, :, :]                 # (1, S, H)
    te = params["type_emb"][type_ids]                      # (B, S, H)
    emb = (we + pe + te).reshape(B * S, H)
    x2 = layernorm(emb, params["emb_ln_g"], params["emb_ln_b"], eps)   # bf16 stream

    # --- extended additive attention mask, kept at (B, 1, S) ---
    mask_add = ((1.0 - mask.astype(jnp.float32)) * (-1e9))[:, None, :]

    for lp in params["layers"]:
        x2 = bert_layer(x2, lp, mask_add, B, S, nh, eps)

    cls = x2.reshape(B, S, H)[:, 0, :].astype(jnp.float32)   # hidden[:, 0, :]
    # Classifier head (H -> 1): a Pallas kernel with N=1 output is pure launch/masked-store
    # overhead, so it is computed in plain JAX.
    return jnp.dot(cls, params["cls_w"]) + params["cls_b"]


# --------------------------------------------------------------------------- main

if __name__ == "__main__":
    B, S = 2, 8
    key = jax.random.PRNGKey(0)
    k_params, k_src = jax.random.split(key)

    params = prepare_params(init_params(k_params, CONFIG), CONFIG)
    source = jax.random.randint(k_src, (B, S), 0, CONFIG["vocab"], dtype=jnp.int32)
    mask = jnp.ones((B, S), dtype=jnp.int32)
    type_ids = jnp.zeros((B, S), dtype=jnp.int32)

    out = jax.jit(bert_model_two)(params, source, mask, type_ids)
    out = jax.block_until_ready(out)
    assert out.shape == (B, 1) and out.dtype == jnp.float32
    print("KERNEL_OK")
</pallas_src>

<mosaic_0001>
module attributes {stable_mosaic.version = 11 : i64} {
  func.func @_layernorm_kernel(%arg0: i32, %arg1: memref<16x128xf32, #tpu.memory_space<vmem>>, %arg2: memref<1x128xf32, #tpu.memory_space<vmem>>, %arg3: memref<1x128xf32, #tpu.memory_space<vmem>>, %arg4: memref<16x128xbf16, #tpu.memory_space<vmem>>) attributes {dimension_semantics = [#tpu.dimension_semantics<parallel>], iteration_bounds = array<i64: 1>, scalar_prefetch = 0 : i64, scratch_operands = 0 : i64, tpu.core_type = #tpu.core_type<tc>, window_params = [{transform_indices = @transform_0, window_bounds = array<i64: 16, 128>}, {pipeline_mode = #tpu.pipeline_mode<synchronous>, transform_indices = @transform_1, window_bounds = array<i64: 1, 128>}, {pipeline_mode = #tpu.pipeline_mode<synchronous>, transform_indices = @transform_2, window_bounds = array<i64: 1, 128>}, {transform_indices = @transform_3, window_bounds = array<i64: 16, 128>}]} {
    %c0 = arith.constant 0 : index
    %c0_0 = arith.constant 0 : index
    %0 = vector.load %arg1[%c0, %c0_0] : memref<16x128xf32, #tpu.memory_space<vmem>>, vector<16x128xf32>
    %cst = arith.constant dense<0.000000e+00> : vector<16xf32>
    %1 = vector.multi_reduction <add>, %0, %cst [1] : vector<16x128xf32> to vector<16xf32>
    %2 = vector.shape_cast %1 : vector<16xf32> to vector<16x1xf32>
    %cst_1 = arith.constant 1.280000e+02 : f32
    %3 = vector.broadcast %cst_1 : f32 to vector<16x1xf32>
    %4 = arith.divf %2, %3 : vector<16x1xf32>
    %5 = vector.broadcast %4 : vector<16x1xf32> to vector<16x128xf32>
    %6 = arith.subf %0, %5 : vector<16x128xf32>
    %7 = arith.mulf %6, %6 : vector<16x128xf32>
    %cst_2 = arith.constant dense<0.000000e+00> : vector<16xf32>
    %8 = vector.multi_reduction <add>, %7, %cst_2 [1] : vector<16x128xf32> to vector<16xf32>
    %9 = vector.shape_cast %8 : vector<16xf32> to vector<16x1xf32>
    %cst_3 = arith.constant 1.280000e+02 : f32
    %10 = vector.broadcast %cst_3 : f32 to vector<16x1xf32>
    %11 = arith.divf %9, %10 : vector<16x1xf32>
    %cst_4 = arith.constant 9.99999996E-13 : f32
    %12 = vector.broadcast %cst_4 : f32 to vector<16x1xf32>
    %13 = arith.addf %11, %12 : vector<16x1xf32>
    %14 = math.rsqrt %13 : vector<16x1xf32>
    %15 = vector.broadcast %14 : vector<16x1xf32> to vector<16x128xf32>
    %16 = arith.mulf %6, %15 : vector<16x128xf32>
    %c0_5 = arith.constant 0 : index
    %c0_6 = arith.constant 0 : index
    %17 = vector.load %arg2[%c0_5, %c0_6] : memref<1x128xf32, #tpu.memory_space<vmem>>, vector<1x128xf32>
    %18 = vector.broadcast %17 : vector<1x128xf32> to vector<16x128xf32>
    %19 = arith.mulf %16, %18 : vector<16x128xf32>
    %c0_7 = arith.constant 0 : index
    %c0_8 = arith.constant 0 : index
    %20 = vector.load %arg3[%c0_7, %c0_8] : memref<1x128xf32, #tpu.memory_space<vmem>>, vector<1x128xf32>
    %21 = vector.broadcast %20 : vector<1x128xf32> to vector<16x128xf32>
    %22 = arith.addf %19, %21 : vector<16x128xf32>
    %23 = arith.truncf %22 : vector<16x128xf32> to vector<16x128xbf16>
    %c0_9 = arith.constant 0 : index
    %c0_10 = arith.constant 0 : index
    %24 = vector.load %arg4[%c0_9, %c0_10] : memref<16x128xbf16, #tpu.memory_space<vmem>>, vector<16x128xbf16>
    tpu.vector_store %arg4[%c0_9, %c0_10], %23 {strides = array<i32>} : memref<16x128xbf16, #tpu.memory_space<vmem>>, vector<16x128xbf16>,
    return
  }
  func.func @transform_0(%arg0: i32) -> (i32, i32) {
    %c0_i32 = arith.constant 0 : i32
    %c0_i32_0 = arith.constant 0 : i32
    return %arg0, %c0_i32 : i32, i32
  }
  func.func @transform_1(%arg0: i32) -> (i32, i32) {
    %c0_i32 = arith.constant 0 : i32
    %c0_i32_0 = arith.constant 0 : i32
    %c0_i32_1 = arith.constant 0 : i32
    return %c0_i32, %c0_i32_0 : i32, i32
  }
  func.func @transform_2(%arg0: i32) -> (i32, i32) {
    %c0_i32 = arith.constant 0 : i32
    %c0_i32_0 = arith.constant 0 : i32
    %c0_i32_1 = arith.constant 0 : i32
    return %c0_i32, %c0_i32_0 : i32, i32
  }
  func.func @transform_3(%arg0: i32) -> (i32, i32) {
    %c0_i32 = arith.constant 0 : i32
    %c0_i32_0 = arith.constant 0 : i32
    return %arg0, %c0_i32 : i32, i32
  }
}

module attributes {stable_mosaic.version = 11 : i64} {
  func.func @_attention_kernel(%arg0: i32, %arg1: i32, %arg2: i32, %arg3: memref<1x8x128xbf16, #tpu.memory_space<vmem>>, %arg4: memref<1x8x128xbf16, #tpu.memory_space<vmem>>, %arg5: memref<1x8x128xbf16, #tpu.memory_space<vmem>>, %arg6: memref<1x1x8xf32, #tpu.memory_space<vmem>>, %arg7: memref<1x8x128xbf16, #tpu.memory_space<vmem>>) attributes {dimension_semantics = [#tpu.dimension_semantics<parallel>, #tpu.dimension_semantics<parallel>, #tpu.dimension_semantics<parallel>], iteration_bounds = array<i64: 2, 1, 1>, scalar_prefetch = 0 : i64, scratch_operands = 0 : i64, tpu.core_type = #tpu.core_type<tc>, window_params = [{transform_indices = @transform_0, window_bounds = array<i64: 1, 8, 128>}, {transform_indices = @transform_1, window_bounds = array<i64: 1, 8, 128>}, {transform_indices = @transform_2, window_bounds = array<i64: 1, 8, 128>}, {transform_indices = @transform_3, window_bounds = array<i64: 1, 1, 8>}, {transform_indices = @transform_4, window_bounds = array<i64: 1, 8, 128>}]} {
    %c0 = arith.constant 0 : index
    %c0_0 = arith.constant 0 : index
    %c0_1 = arith.constant 0 : index
    %0 = vector.load %arg6[%c0, %c0_0, %c0_1] : memref<1x1x8xf32, #tpu.memory_space<vmem>>, vector<1x1x8xf32>
    %1 = vector.shape_cast %0 : vector<1x1x8xf32> to vector<1x8xf32>
    %c0_2 = arith.constant 0 : index
    %c0_3 = arith.constant 0 : index
    %c0_4 = arith.constant 0 : index
    %2 = vector.load %arg3[%c0_2, %c0_3, %c0_4] : memref<1x8x128xbf16, #tpu.memory_space<vmem>>, vector<1x8x128xbf16>
    %3 = vector.shape_cast %2 : vector<1x8x128xbf16> to vector<8x128xbf16>
    %c0_5 = arith.constant 0 : index
    %c0_6 = arith.constant 0 : index
    %c0_7 = arith.constant 0 : index
    %4 = vector.load %arg4[%c0_5, %c0_6, %c0_7] : memref<1x8x128xbf16, #tpu.memory_space<vmem>>, vector<1x8x128xbf16>
    %5 = vector.shape_cast %4 : vector<1x8x128xbf16> to vector<8x128xbf16>
    %c0_8 = arith.constant 0 : index
    %c0_9 = arith.constant 0 : index
    %c0_10 = arith.constant 0 : index
    %6 = vector.load %arg5[%c0_8, %c0_9, %c0_10] : memref<1x8x128xbf16, #tpu.memory_space<vmem>>, vector<1x8x128xbf16>
    %7 = vector.shape_cast %6 : vector<1x8x128xbf16> to vector<8x128xbf16>
    %8 = vector.extract_strided_slice %3 {offsets = [0, 0], sizes = [8, 32], strides = [1, 1]} : vector<8x128xbf16> to vector<8x32xbf16>
    %9 = vector.extract_strided_slice %5 {offsets = [0, 0], sizes = [8, 32], strides = [1, 1]} : vector<8x128xbf16> to vector<8x32xbf16>
    %cst = arith.constant dense<0.000000e+00> : vector<8x8xf32>
    %10 = tpu.matmul %8, %9, %cst {dimension_numbers = #tpu.dot_dimension_numbers<[1], [1], [0], [0], [0, 0, 1, 0], [], []>} : vector<8x32xbf16>, vector<8x32xbf16>, vector<8x8xf32> -> vector<8x8xf32>
    %11 = vector.broadcast %1 : vector<1x8xf32> to vector<8x8xf32>
    %12 = arith.addf %10, %11 : vector<8x8xf32>
    %cst_11 = arith.constant dense<0xFF800000> : vector<8xf32>
    %13 = vector.multi_reduction <maximumf>, %12, %cst_11 [1] : vector<8x8xf32> to vector<8xf32>
    %14 = vector.shape_cast %13 : vector<8xf32> to vector<8x1xf32>
    %15 = vector.broadcast %14 : vector<8x1xf32> to vector<8x8xf32>
    %16 = arith.subf %12, %15 : vector<8x8xf32>
    %17 = math.exp %16 : vector<8x8xf32>
    %cst_12 = arith.constant dense<0.000000e+00> : vector<8xf32>
    %18 = vector.multi_reduction <add>, %17, %cst_12 [1] : vector<8x8xf32> to vector<8xf32>
    %19 = vector.shape_cast %18 : vector<8xf32> to vector<8x1xf32>
    %20 = tpu.reciprocal %19 {approx = true} : vector<8x1xf32> -> vector<8x1xf32>
    %21 = vector.broadcast %20 : vector<8x1xf32> to vector<8x8xf32>
    %22 = arith.mulf %17, %21 : vector<8x8xf32>
    %23 = arith.truncf %22 : vector<8x8xf32> to vector<8x8xbf16>
    %24 = vector.extract_strided_slice %7 {offsets = [0, 0], sizes = [8, 32], strides = [1, 1]} : vector<8x128xbf16> to vector<8x32xbf16>
    %cst_13 = arith.constant dense<0.000000e+00> : vector<8x32xf32>
    %25 = tpu.matmul %23, %24, %cst_13 {dimension_numbers = #tpu.dot_dimension_numbers<[1], [0], [0], [1], [0, 0, 1, 1], [], []>} : vector<8x8xbf16>, vector<8x32xbf16>, vector<8x32xf32> -> vector<8x32xf32>
    %26 = vector.extract_strided_slice %3 {offsets = [0, 32], sizes = [8, 32], strides = [1, 1]} : vector<8x128xbf16> to vector<8x32xbf16>
    %27 = vector.extract_strided_slice %5 {offsets = [0, 32], sizes = [8, 32], strides = [1, 1]} : vector<8x128xbf16> to vector<8x32xbf16>
    %cst_14 = arith.constant dense<0.000000e+00> : vector<8x8xf32>
    %28 = tpu.matmul %26, %27, %cst_14 {dimension_numbers = #tpu.dot_dimension_numbers<[1], [1], [0], [0], [0, 0, 1, 0], [], []>} : vector<8x32xbf16>, vector<8x32xbf16>, vector<8x8xf32> -> vector<8x8xf32>
    %29 = vector.broadcast %1 : vector<1x8xf32> to vector<8x8xf32>
    %30 = arith.addf %28, %29 : vector<8x8xf32>
    %cst_15 = arith.constant dense<0xFF800000> : vector<8xf32>
    %31 = vector.multi_reduction <maximumf>, %30, %cst_15 [1] : vector<8x8xf32> to vector<8xf32>
    %32 = vector.shape_cast %31 : vector<8xf32> to vector<8x1xf32>
    %33 = vector.broadcast %32 : vector<8x1xf32> to vector<8x8xf32>
    %34 = arith.subf %30, %33 : vector<8x8xf32>
    %35 = math.exp %34 : vector<8x8xf32>
    %cst_16 = arith.constant dense<0.000000e+00> : vector<8xf32>
    %36 = vector.multi_reduction <add>, %35, %cst_16 [1] : vector<8x8xf32> to vector<8xf32>
    %37 = vector.shape_cast %36 : vector<8xf32> to vector<8x1xf32>
    %38 = tpu.reciprocal %37 {approx = true} : vector<8x1xf32> -> vector<8x1xf32>
    %39 = vector.broadcast %38 : vector<8x1xf32> to vector<8x8xf32>
    %40 = arith.mulf %35, %39 : vector<8x8xf32>
    %41 = arith.truncf %40 : vector<8x8xf32> to vector<8x8xbf16>
    %42 = vector.extract_strided_slice %7 {offsets = [0, 32], sizes = [8, 32], strides = [1, 1]} : vector<8x128xbf16> to vector<8x32xbf16>
    %cst_17 = arith.constant dense<0.000000e+00> : vector<8x32xf32>
    %43 = tpu.matmul %41, %42, %cst_17 {dimension_numbers = #tpu.dot_dimension_numbers<[1], [0], [0], [1], [0, 0, 1, 1], [], []>} : vector<8x8xbf16>, vector<8x32xbf16>, vector<8x32xf32> -> vector<8x32xf32>
    %44 = vector.extract_strided_slice %3 {offsets = [0, 64], sizes = [8, 32], strides = [1, 1]} : vector<8x128xbf16> to vector<8x32xbf16>
    %45 = vector.extract_strided_slice %5 {offsets = [0, 64], sizes = [8, 32], strides = [1, 1]} : vector<8x128xbf16> to vector<8x32xbf16>
    %cst_18 = arith.constant dense<0.000000e+00> : vector<8x8xf32>
    %46 = tpu.matmul %44, %45, %cst_18 {dimension_numbers = #tpu.dot_dimension_numbers<[1], [1], [0], [0], [0, 0, 1, 0], [], []>} : vector<8x32xbf16>, vector<8x32xbf16>, vector<8x8xf32> -> vector<8x8xf32>
    %47 = vector.broadcast %1 : vector<1x8xf32> to vector<8x8xf32>
    %48 = arith.addf %46, %47 : vector<8x8xf32>
    %cst_19 = arith.constant dense<0xFF800000> : vector<8xf32>
    %49 = vector.multi_reduction <maximumf>, %48, %cst_19 [1] : vector<8x8xf32> to vector<8xf32>
    %50 = vector.shape_cast %49 : vector<8xf32> to vector<8x1xf32>
    %51 = vector.broadcast %50 : vector<8x1xf32> to vector<8x8xf32>
    %52 = arith.subf %48, %51 : vector<8x8xf32>
    %53 = math.exp %52 : vector<8x8xf32>
    %cst_20 = arith.constant dense<0.000000e+00> : vector<8xf32>
    %54 = vector.multi_reduction <add>, %53, %cst_20 [1] : vector<8x8xf32> to vector<8xf32>
    %55 = vector.shape_cast %54 : vector<8xf32> to vector<8x1xf32>
    %56 = tpu.reciprocal %55 {approx = true} : vector<8x1xf32> -> vector<8x1xf32>
    %57 = vector.broadcast %56 : vector<8x1xf32> to vector<8x8xf32>
    %58 = arith.mulf %53, %57 : vector<8x8xf32>
    %59 = arith.truncf %58 : vector<8x8xf32> to vector<8x8xbf16>
    %60 = vector.extract_strided_slice %7 {offsets = [0, 64], sizes = [8, 32], strides = [1, 1]} : vector<8x128xbf16> to vector<8x32xbf16>
    %cst_21 = arith.constant dense<0.000000e+00> : vector<8x32xf32>
    %61 = tpu.matmul %59, %60, %cst_21 {dimension_numbers = #tpu.dot_dimension_numbers<[1], [0], [0], [1], [0, 0, 1, 1], [], []>} : vector<8x8xbf16>, vector<8x32xbf16>, vector<8x32xf32> -> vector<8x32xf32>
    %62 = vector.extract_strided_slice %3 {offsets = [0, 96], sizes = [8, 32], strides = [1, 1]} : vector<8x128xbf16> to vector<8x32xbf16>
    %63 = vector.extract_strided_slice %5 {offsets = [0, 96], sizes = [8, 32], strides = [1, 1]} : vector<8x128xbf16> to vector<8x32xbf16>
    %cst_22 = arith.constant dense<0.000000e+00> : vector<8x8xf32>
    %64 = tpu.matmul %62, %63, %cst_22 {dimension_numbers = #tpu.dot_dimension_numbers<[1], [1], [0], [0], [0, 0, 1, 0], [], []>} : vector<8x32xbf16>, vector<8x32xbf16>, vector<8x8xf32> -> vector<8x8xf32>
    %65 = vector.broadcast %1 : vector<1x8xf32> to vector<8x8xf32>
    %66 = arith.addf %64, %65 : vector<8x8xf32>
    %cst_23 = arith.constant dense<0xFF800000> : vector<8xf32>
    %67 = vector.multi_reduction <maximumf>, %66, %cst_23 [1] : vector<8x8xf32> to vector<8xf32>
    %68 = vector.shape_cast %67 : vector<8xf32> to vector<8x1xf32>
    %69 = vector.broadcast %68 : vector<8x1xf32> to vector<8x8xf32>
    %70 = arith.subf %66, %69 : vector<8x8xf32>
    %71 = math.exp %70 : vector<8x8xf32>
    %cst_24 = arith.constant dense<0.000000e+00> : vector<8xf32>
    %72 = vector.multi_reduction <add>, %71, %cst_24 [1] : vector<8x8xf32> to vector<8xf32>
    %73 = vector.shape_cast %72 : vector<8xf32> to vector<8x1xf32>
    %74 = tpu.reciprocal %73 {approx = true} : vector<8x1xf32> -> vector<8x1xf32>
    %75 = vector.broadcast %74 : vector<8x1xf32> to vector<8x8xf32>
    %76 = arith.mulf %71, %75 : vector<8x8xf32>
    %77 = arith.truncf %76 : vector<8x8xf32> to vector<8x8xbf16>
    %78 = vector.extract_strided_slice %7 {offsets = [0, 96], sizes = [8, 32], strides = [1, 1]} : vector<8x128xbf16> to vector<8x32xbf16>
    %cst_25 = arith.constant dense<0.000000e+00> : vector<8x32xf32>
    %79 = tpu.matmul %77, %78, %cst_25 {dimension_numbers = #tpu.dot_dimension_numbers<[1], [0], [0], [1], [0, 0, 1, 1], [], []>} : vector<8x8xbf16>, vector<8x32xbf16>, vector<8x32xf32> -> vector<8x32xf32>
    %80 = tpu.concatenate %25, %43, %61, %79 in 1 : vector<8x32xf32>, vector<8x32xf32>, vector<8x32xf32>, vector<8x32xf32> -> vector<8x128xf32>
    %81 = arith.truncf %80 : vector<8x128xf32> to vector<8x128xbf16>
    %c0_26 = arith.constant 0 : index
    %c0_27 = arith.constant 0 : index
    %c0_28 = arith.constant 0 : index
    %82 = vector.load %arg7[%c0_26, %c0_27, %c0_28] : memref<1x8x128xbf16, #tpu.memory_space<vmem>>, vector<1x8x128xbf16>
    %83 = vector.shape_cast %82 : vector<1x8x128xbf16> to vector<8x128xbf16>
    %84 = vector.shape_cast %81 : vector<8x128xbf16> to vector<1x8x128xbf16>
    tpu.vector_store %arg7[%c0_26, %c0_27, %c0_28], %84 {strides = array<i32>} : memref<1x8x128xbf16, #tpu.memory_space<vmem>>, vector<1x8x128xbf16>,
    return
  }
  func.func @transform_0(%arg0: i32, %arg1: i32, %arg2: i32) -> (i32, i32, i32) {
    %c0_i32 = arith.constant 0 : i32
    return %arg0, %arg2, %arg1 : i32, i32, i32
  }
  func.func @transform_1(%arg0: i32, %arg1: i32, %arg2: i32) -> (i32, i32, i32) {
    %c1_i32 = arith.constant 1 : i32
    %0 = arith.addi %c1_i32, %arg1 : i32
    %c0_i32 = arith.constant 0 : i32
    %c0_i32_0 = arith.constant 0 : i32
    return %arg0, %c0_i32, %0 : i32, i32, i32
  }
  func.func @transform_2(%arg0: i32, %arg1: i32, %arg2: i32) -> (i32, i32, i32) {
    %c2_i32 = arith.constant 2 : i32
    %0 = arith.addi %c2_i32, %arg1 : i32
    %c0_i32 = arith.constant 0 : i32
    %c0_i32_0 = arith.constant 0 : i32
    return %arg0, %c0_i32, %0 : i32, i32, i32
  }
  func.func @transform_3(%arg0: i32, %arg1: i32, %arg2: i32) -> (i32, i32, i32) {
    %c0_i32 = arith.constant 0 : i32
    %c0_i32_0 = arith.constant 0 : i32
    %c0_i32_1 = arith.constant 0 : i32
    return %arg0, %c0_i32, %c0_i32_0 : i32, i32, i32
  }
  func.func @transform_4(%arg0: i32, %arg1: i32, %arg2: i32) -> (i32, i32, i32) {
    %c0_i32 = arith.constant 0 : i32
    return %arg0, %arg2, %arg1 : i32, i32, i32
  }
}

module attributes {stable_mosaic.version = 11 : i64} {
  func.func @_linear_kernel(%arg0: i32, %arg1: i32, %arg2: i32, %arg3: memref<16x128xbf16, #tpu.memory_space<vmem>>, %arg4: memref<128x384xbf16, #tpu.memory_space<vmem>>, %arg5: memref<1x384xf32, #tpu.memory_space<vmem>>, %arg6: memref<16x384xbf16, #tpu.memory_space<vmem>>, %arg7: memref<16x384xf32, #tpu.memory_space<vmem>>) attributes {dimension_semantics = [#tpu.dimension_semantics<parallel>, #tpu.dimension_semantics<parallel>, #tpu.dimension_semantics<arbitrary>], iteration_bounds = array<i64: 1, 1, 1>, scalar_prefetch = 0 : i64, scratch_operands = 1 : i64, tpu.core_type = #tpu.core_type<tc>, window_params = [{transform_indices = @transform_0, window_bounds = array<i64: 16, 128>}, {transform_indices = @transform_1, window_bounds = array<i64: 128, 384>}, {transform_indices = @transform_2, window_bounds = array<i64: 1, 384>}, {transform_indices = @transform_3, window_bounds = array<i64: 16, 384>}]} {
    %c0_i32 = arith.constant 0 : i32
    %0 = arith.cmpi eq, %arg2, %c0_i32 : i32
    %1 = arith.extui %0 : i1 to i32
    %c0_i32_0 = arith.constant 0 : i32
    %2 = arith.cmpi ne, %1, %c0_i32_0 : i32
    scf.if %2 {
      %cst_10 = arith.constant 0.000000e+00 : f32
      %12 = vector.broadcast %cst_10 : f32 to vector<16x384xf32>
      %c0_11 = arith.constant 0 : index
      %c0_12 = arith.constant 0 : index
      %13 = vector.load %arg7[%c0_11, %c0_12] : memref<16x384xf32, #tpu.memory_space<vmem>>, vector<16x384xf32>
      tpu.vector_store %arg7[%c0_11, %c0_12], %12 {strides = array<i32>} : memref<16x384xf32, #tpu.memory_space<vmem>>, vector<16x384xf32>,
    } else {
    }
    %c0 = arith.constant 0 : index
    %c0_1 = arith.constant 0 : index
    %3 = vector.load %arg7[%c0, %c0_1] : memref<16x384xf32, #tpu.memory_space<vmem>>, vector<16x384xf32>
    %c0_2 = arith.constant 0 : index
    %c0_3 = arith.constant 0 : index
    %4 = vector.load %arg3[%c0_2, %c0_3] : memref<16x128xbf16, #tpu.memory_space<vmem>>, vector<16x128xbf16>
    %c0_4 = arith.constant 0 : index
    %c0_5 = arith.constant 0 : index
    %5 = vector.load %arg4[%c0_4, %c0_5] : memref<128x384xbf16, #tpu.memory_space<vmem>>, vector<128x384xbf16>
    %cst = arith.constant dense<0.000000e+00> : vector<16x384xf32>
    %6 = tpu.matmul %4, %5, %cst {dimension_numbers = #tpu.dot_dimension_numbers<[1], [0], [0], [1], [0, 0, 1, 1], [], []>} : vector<16x128xbf16>, vector<128x384xbf16>, vector<16x384xf32> -> vector<16x384xf32>
    %7 = arith.addf %3, %6 : vector<16x384xf32>
    %c0_6 = arith.constant 0 : index
    %c0_7 = arith.constant 0 : index
    %8 = vector.load %arg7[%c0_6, %c0_7] : memref<16x384xf32, #tpu.memory_space<vmem>>, vector<16x384xf32>
    tpu.vector_store %arg7[%c0_6, %c0_7], %7 {strides = array<i32>} : memref<16x384xf32, #tpu.memory_space<vmem>>, vector<16x384xf32>,
    %c0_i32_8 = arith.constant 0 : i32
    %9 = arith.cmpi eq, %arg2, %c0_i32_8 : i32
    %10 = arith.extui %9 : i1 to i32
    %c0_i32_9 = arith.constant 0 : i32
    %11 = arith.cmpi ne, %10, %c0_i32_9 : i32
    scf.if %11 {
      %c0_10 = arith.constant 0 : index
      %c0_11 = arith.constant 0 : index
      %12 = vector.load %arg7[%c0_10, %c0_11] : memref<16x384xf32, #tpu.memory_space<vmem>>, vector<16x384xf32>
      %c0_12 = arith.constant 0 : index
      %c0_13 = arith.constant 0 : index
      %13 = vector.load %arg5[%c0_12, %c0_13] : memref<1x384xf32, #tpu.memory_space<vmem>>, vector<1x384xf32>
      %14 = vector.broadcast %13 : vector<1x384xf32> to vector<16x384xf32>
      %15 = arith.addf %12, %14 : vector<16x384xf32>
      %16 = arith.truncf %15 : vector<16x384xf32> to vector<16x384xbf16>
      %c0_14 = arith.constant 0 : index
      %c0_15 = arith.constant 0 : index
      %17 = vector.load %arg6[%c0_14, %c0_15] : memref<16x384xbf16, #tpu.memory_space<vmem>>, vector<16x384xbf16>
      tpu.vector_store %arg6[%c0_14, %c0_15], %16 {strides = array<i32>} : memref<16x384xbf16, #tpu.memory_space<vmem>>, vector<16x384xbf16>,
    } else {
    }
    return
  }
  func.func @transform_0(%arg0: i32, %arg1: i32, %arg2: i32) -> (i32, i32) {
    %c0_i32 = arith.constant 0 : i32
    return %arg0, %arg2 : i32, i32
  }
  func.func @transform_1(%arg0: i32, %arg1: i32, %arg2: i32) -> (i32, i32) {
    %c0_i32 = arith.constant 0 : i32
    return %arg2, %arg1 : i32, i32
  }
  func.func @transform_2(%arg0: i32, %arg1: i32, %arg2: i32) -> (i32, i32) {
    %c0_i32 = arith.constant 0 : i32
    %c0_i32_0 = arith.constant 0 : i32
    return %c0_i32, %arg1 : i32, i32
  }
  func.func @transform_3(%arg0: i32, %arg1: i32, %arg2: i32) -> (i32, i32) {
    %c0_i32 = arith.constant 0 : i32
    return %arg0, %arg1 : i32, i32
  }
}

module attributes {stable_mosaic.version = 11 : i64} {
  func.func @_linear_res_ln_kernel(%arg0: i32, %arg1: i32, %arg2: memref<16x128xbf16, #tpu.memory_space<vmem>>, %arg3: memref<128x128xbf16, #tpu.memory_space<vmem>>, %arg4: memref<1x128xf32, #tpu.memory_space<vmem>>, %arg5: memref<16x128xbf16, #tpu.memory_space<vmem>>, %arg6: memref<1x128xf32, #tpu.memory_space<vmem>>, %arg7: memref<1x128xf32, #tpu.memory_space<vmem>>, %arg8: memref<16x128xbf16, #tpu.memory_space<vmem>>, %arg9: memref<16x128xf32, #tpu.memory_space<vmem>>) attributes {dimension_semantics = [#tpu.dimension_semantics<parallel>, #tpu.dimension_semantics<arbitrary>], iteration_bounds = array<i64: 1, 1>, scalar_prefetch = 0 : i64, scratch_operands = 1 : i64, tpu.core_type = #tpu.core_type<tc>, window_params = [{transform_indices = @transform_0, window_bounds = array<i64: 16, 128>}, {transform_indices = @transform_1, window_bounds = array<i64: 128, 128>}, {pipeline_mode = #tpu.pipeline_mode<synchronous>, transform_indices = @transform_2, window_bounds = array<i64: 1, 128>}, {transform_indices = @transform_3, window_bounds = array<i64: 16, 128>}, {pipeline_mode = #tpu.pipeline_mode<synchronous>, transform_indices = @transform_4, window_bounds = array<i64: 1, 128>}, {pipeline_mode = #tpu.pipeline_mode<synchronous>, transform_indices = @transform_5, window_bounds = array<i64: 1, 128>}, {transform_indices = @transform_6, window_bounds = array<i64: 16, 128>}]} {
    %c0_i32 = arith.constant 0 : i32
    %0 = arith.cmpi eq, %arg1, %c0_i32 : i32
    %1 = arith.extui %0 : i1 to i32
    %c0_i32_0 = arith.constant 0 : i32
    %2 = arith.cmpi ne, %1, %c0_i32_0 : i32
    scf.if %2 {
      %cst_10 = arith.constant 0.000000e+00 : f32
      %12 = vector.broadcast %cst_10 : f32 to vector<16x128xf32>
      %c0_11 = arith.constant 0 : index
      %c0_12 = arith.constant 0 : index
      %13 = vector.load %arg9[%c0_11, %c0_12] : memref<16x128xf32, #tpu.memory_space<vmem>>, vector<16x128xf32>
      tpu.vector_store %arg9[%c0_11, %c0_12], %12 {strides = array<i32>} : memref<16x128xf32, #tpu.memory_space<vmem>>, vector<16x128xf32>,
    } else {
    }
    %c0 = arith.constant 0 : index
    %c0_1 = arith.constant 0 : index
    %3 = vector.load %arg9[%c0, %c0_1] : memref<16x128xf32, #tpu.memory_space<vmem>>, vector<16x128xf32>
    %c0_2 = arith.constant 0 : index
    %c0_3 = arith.constant 0 : index
    %4 = vector.load %arg2[%c0_2, %c0_3] : memref<16x128xbf16, #tpu.memory_space<vmem>>, vector<16x128xbf16>
    %c0_4 = arith.constant 0 : index
    %c0_5 = arith.constant 0 : index
    %5 = vector.load %arg3[%c0_4, %c0_5] : memref<128x128xbf16, #tpu.memory_space<vmem>>, vector<128x128xbf16>
    %cst = arith.constant dense<0.000000e+00> : vector<16x128xf32>
    %6 = tpu.matmul %4, %5, %cst {dimension_numbers = #tpu.dot_dimension_numbers<[1], [0], [0], [1], [0, 0, 1, 1], [], []>} : vector<16x128xbf16>, vector<128x128xbf16>, vector<16x128xf32> -> vector<16x128xf32>
    %7 = arith.addf %3, %6 : vector<16x128xf32>
    %c0_6 = arith.constant 0 : index
    %c0_7 = arith.constant 0 : index
    %8 = vector.load %arg9[%c0_6, %c0_7] : memref<16x128xf32, #tpu.memory_space<vmem>>, vector<16x128xf32>
    tpu.vector_store %arg9[%c0_6, %c0_7], %7 {strides = array<i32>} : memref<16x128xf32, #tpu.memory_space<vmem>>, vector<16x128xf32>,
    %c0_i32_8 = arith.constant 0 : i32
    %9 = arith.cmpi eq, %arg1, %c0_i32_8 : i32
    %10 = arith.extui %9 : i1 to i32
    %c0_i32_9 = arith.constant 0 : i32
    %11 = arith.cmpi ne, %10, %c0_i32_9 : i32
    scf.if %11 {
      %c0_10 = arith.constant 0 : index
      %c0_11 = arith.constant 0 : index
      %12 = vector.load %arg9[%c0_10, %c0_11] : memref<16x128xf32, #tpu.memory_space<vmem>>, vector<16x128xf32>
      %c0_12 = arith.constant 0 : index
      %c0_13 = arith.constant 0 : index
      %13 = vector.load %arg4[%c0_12, %c0_13] : memref<1x128xf32, #tpu.memory_space<vmem>>, vector<1x128xf32>
      %14 = vector.broadcast %13 : vector<1x128xf32> to vector<16x128xf32>
      %15 = arith.addf %12, %14 : vector<16x128xf32>
      %c0_14 = arith.constant 0 : index
      %c0_15 = arith.constant 0 : index
      %16 = vector.load %arg5[%c0_14, %c0_15] : memref<16x128xbf16, #tpu.memory_space<vmem>>, vector<16x128xbf16>
      %17 = arith.extf %16 : vector<16x128xbf16> to vector<16x128xf32>
      %18 = arith.addf %15, %17 : vector<16x128xf32>
      %cst_16 = arith.constant dense<0.000000e+00> : vector<16xf32>
      %19 = vector.multi_reduction <add>, %18, %cst_16 [1] : vector<16x128xf32> to vector<16xf32>
      %20 = vector.shape_cast %19 : vector<16xf32> to vector<16x1xf32>
      %cst_17 = arith.constant 1.280000e+02 : f32
      %21 = vector.broadcast %cst_17 : f32 to vector<16x1xf32>
      %22 = arith.divf %20, %21 : vector<16x1xf32>
      %23 = vector.broadcast %22 : vector<16x1xf32> to vector<16x128xf32>
      %24 = arith.subf %18, %23 : vector<16x128xf32>
      %25 = arith.mulf %24, %24 : vector<16x128xf32>
      %cst_18 = arith.constant dense<0.000000e+00> : vector<16xf32>
      %26 = vector.multi_reduction <add>, %25, %cst_18 [1] : vector<16x128xf32> to vector<16xf32>
      %27 = vector.shape_cast %26 : vector<16xf32> to vector<16x1xf32>
      %cst_19 = arith.constant 1.280000e+02 : f32
      %28 = vector.broadcast %cst_19 : f32 to vector<16x1xf32>
      %29 = arith.divf %27, %28 : vector<16x1xf32>
      %cst_20 = arith.constant 9.99999996E-13 : f32
      %30 = vector.broadcast %cst_20 : f32 to vector<16x1xf32>
      %31 = arith.addf %29, %30 : vector<16x1xf32>
      %32 = math.rsqrt %31 : vector<16x1xf32>
      %33 = vector.broadcast %32 : vector<16x1xf32> to vector<16x128xf32>
      %34 = arith.mulf %24, %33 : vector<16x128xf32>
      %c0_21 = arith.constant 0 : index
      %c0_22 = arith.constant 0 : index
      %35 = vector.load %arg6[%c0_21, %c0_22] : memref<1x128xf32, #tpu.memory_space<vmem>>, vector<1x128xf32>
      %36 = vector.broadcast %35 : vector<1x128xf32> to vector<16x128xf32>
      %37 = arith.mulf %34, %36 : vector<16x128xf32>
      %c0_23 = arith.constant 0 : index
      %c0_24 = arith.constant 0 : index
      %38 = vector.load %arg7[%c0_23, %c0_24] : memref<1x128xf32, #tpu.memory_space<vmem>>, vector<1x128xf32>
      %39 = vector.broadcast %38 : vector<1x128xf32> to vector<16x128xf32>
      %40 = arith.addf %37, %39 : vector<16x128xf32>
      %41 = arith.truncf %40 : vector<16x128xf32> to vector<16x128xbf16>
      %c0_25 = arith.constant 0 : index
      %c0_26 = arith.constant 0 : index
      %42 = vector.load %arg8[%c0_25, %c0_26] : memref<16x128xbf16, #tpu.memory_space<vmem>>, vector<16x128xbf16>
      tpu.vector_store %arg8[%c0_25, %c0_26], %41 {strides = array<i32>} : memref<16x128xbf16, #tpu.memory_space<vmem>>, vector<16x128xbf16>,
    } else {
    }
    return
  }
  func.func @transform_0(%arg0: i32, %arg1: i32) -> (i32, i32) {
    %c0_i32 = arith.constant 0 : i32
    return %arg0, %arg1 : i32, i32
  }
  func.func @transform_1(%arg0: i32, %arg1: i32) -> (i32, i32) {
    %c0_i32 = arith.constant 0 : i32
    %c0_i32_0 = arith.constant 0 : i32
    return %arg1, %c0_i32 : i32, i32
  }
  func.func @transform_2(%arg0: i32, %arg1: i32) -> (i32, i32) {
    %c0_i32 = arith.constant 0 : i32
    %c0_i32_0 = arith.constant 0 : i32
    %c0_i32_1 = arith.constant 0 : i32
    return %c0_i32, %c0_i32_0 : i32, i32
  }
  func.func @transform_3(%arg0: i32, %arg1: i32) -> (i32, i32) {
    %c0_i32 = arith.constant 0 : i32
    %c0_i32_0 = arith.constant 0 : i32
    return %arg0, %c0_i32 : i32, i32
  }
  func.func @transform_4(%arg0: i32, %arg1: i32) -> (i32, i32) {
    %c0_i32 = arith.constant 0 : i32
    %c0_i32_0 = arith.constant 0 : i32
    %c0_i32_1 = arith.constant 0 : i32
    return %c0_i32, %c0_i32_0 : i32, i32
  }
  func.func @transform_5(%arg0: i32, %arg1: i32) -> (i32, i32) {
    %c0_i32 = arith.constant 0 : i32
    %c0_i32_0 = arith.constant 0 : i32
    %c0_i32_1 = arith.constant 0 : i32
    return %c0_i32, %c0_i32_0 : i32, i32
  }
  func.func @transform_6(%arg0: i32, %arg1: i32) -> (i32, i32) {
    %c0_i32 = arith.constant 0 : i32
    %c0_i32_0 = arith.constant 0 : i32
    return %arg0, %c0_i32 : i32, i32
  }
}

module attributes {stable_mosaic.version = 11 : i64} {
  func.func @_linear_kernel(%arg0: i32, %arg1: i32, %arg2: i32, %arg3: memref<16x128xbf16, #tpu.memory_space<vmem>>, %arg4: memref<128x512xbf16, #tpu.memory_space<vmem>>, %arg5: memref<1x512xf32, #tpu.memory_space<vmem>>, %arg6: memref<16x512xbf16, #tpu.memory_space<vmem>>, %arg7: memref<16x512xf32, #tpu.memory_space<vmem>>) attributes {dimension_semantics = [#tpu.dimension_semantics<parallel>, #tpu.dimension_semantics<parallel>, #tpu.dimension_semantics<arbitrary>], iteration_bounds = array<i64: 1, 1, 1>, scalar_prefetch = 0 : i64, scratch_operands = 1 : i64, tpu.core_type = #tpu.core_type<tc>, window_params = [{transform_indices = @transform_0, window_bounds = array<i64: 16, 128>}, {transform_indices = @transform_1, window_bounds = array<i64: 128, 512>}, {transform_indices = @transform_2, window_bounds = array<i64: 1, 512>}, {transform_indices = @transform_3, window_bounds = array<i64: 16, 512>}]} {
    %c0_i32 = arith.constant 0 : i32
    %0 = arith.cmpi eq, %arg2, %c0_i32 : i32
    %1 = arith.extui %0 : i1 to i32
    %c0_i32_0 = arith.constant 0 : i32
    %2 = arith.cmpi ne, %1, %c0_i32_0 : i32
    scf.if %2 {
      %cst_10 = arith.constant 0.000000e+00 : f32
      %12 = vector.broadcast %cst_10 : f32 to vector<16x512xf32>
      %c0_11 = arith.constant 0 : index
      %c0_12 = arith.constant 0 : index
      %13 = vector.load %arg7[%c0_11, %c0_12] : memref<16x512xf32, #tpu.memory_space<vmem>>, vector<16x512xf32>
      tpu.vector_store %arg7[%c0_11, %c0_12], %12 {strides = array<i32>} : memref<16x512xf32, #tpu.memory_space<vmem>>, vector<16x512xf32>,
    } else {
    }
    %c0 = arith.constant 0 : index
    %c0_1 = arith.constant 0 : index
    %3 = vector.load %arg7[%c0, %c0_1] : memref<16x512xf32, #tpu.memory_space<vmem>>, vector<16x512xf32>
    %c0_2 = arith.constant 0 : index
    %c0_3 = arith.constant 0 : index
    %4 = vector.load %arg3[%c0_2, %c0_3] : memref<16x128xbf16, #tpu.memory_space<vmem>>, vector<16x128xbf16>
    %c0_4 = arith.constant 0 : index
    %c0_5 = arith.constant 0 : index
    %5 = vector.load %arg4[%c0_4, %c0_5] : memref<128x512xbf16, #tpu.memory_space<vmem>>, vector<128x512xbf16>
    %cst = arith.constant dense<0.000000e+00> : vector<16x512xf32>
    %6 = tpu.matmul %4, %5, %cst {dimension_numbers = #tpu.dot_dimension_numbers<[1], [0], [0], [1], [0, 0, 1, 1], [], []>} : vector<16x128xbf16>, vector<128x512xbf16>, vector<16x512xf32> -> vector<16x512xf32>
    %7 = arith.addf %3, %6 : vector<16x512xf32>
    %c0_6 = arith.constant 0 : index
    %c0_7 = arith.constant 0 : index
    %8 = vector.load %arg7[%c0_6, %c0_7] : memref<16x512xf32, #tpu.memory_space<vmem>>, vector<16x512xf32>
    tpu.vector_store %arg7[%c0_6, %c0_7], %7 {strides = array<i32>} : memref<16x512xf32, #tpu.memory_space<vmem>>, vector<16x512xf32>,
    %c0_i32_8 = arith.constant 0 : i32
    %9 = arith.cmpi eq, %arg2, %c0_i32_8 : i32
    %10 = arith.extui %9 : i1 to i32
    %c0_i32_9 = arith.constant 0 : i32
    %11 = arith.cmpi ne, %10, %c0_i32_9 : i32
    scf.if %11 {
      %c0_10 = arith.constant 0 : index
      %c0_11 = arith.constant 0 : index
      %12 = vector.load %arg7[%c0_10, %c0_11] : memref<16x512xf32, #tpu.memory_space<vmem>>, vector<16x512xf32>
      %c0_12 = arith.constant 0 : index
      %c0_13 = arith.constant 0 : index
      %13 = vector.load %arg5[%c0_12, %c0_13] : memref<1x512xf32, #tpu.memory_space<vmem>>, vector<1x512xf32>
      %14 = vector.broadcast %13 : vector<1x512xf32> to vector<16x512xf32>
      %15 = arith.addf %12, %14 : vector<16x512xf32>
      %cst_14 = arith.constant 5.000000e-01 : f32
      %16 = vector.broadcast %cst_14 : f32 to vector<16x512xf32>
      %17 = arith.mulf %16, %15 : vector<16x512xf32>
      %cst_15 = arith.constant 4.471500e-02 : f32
      %18 = vector.broadcast %cst_15 : f32 to vector<16x512xf32>
      %19 = arith.mulf %18, %15 : vector<16x512xf32>
      %20 = arith.mulf %19, %15 : vector<16x512xf32>
      %21 = arith.mulf %20, %15 : vector<16x512xf32>
      %22 = arith.addf %15, %21 : vector<16x512xf32>
      %cst_16 = arith.constant 0.797884583 : f32
      %23 = vector.broadcast %cst_16 : f32 to vector<16x512xf32>
      %24 = arith.mulf %23, %22 : vector<16x512xf32>
      %25 = math.tanh %24 : vector<16x512xf32>
      %cst_17 = arith.constant 1.000000e+00 : f32
      %26 = vector.broadcast %cst_17 : f32 to vector<16x512xf32>
      %27 = arith.addf %26, %25 : vector<16x512xf32>
      %28 = arith.mulf %17, %27 : vector<16x512xf32>
      %29 = arith.truncf %28 : vector<16x512xf32> to vector<16x512xbf16>
      %c0_18 = arith.constant 0 : index
      %c0_19 = arith.constant 0 : index
      %30 = vector.load %arg6[%c0_18, %c0_19] : memref<16x512xbf16, #tpu.memory_space<vmem>>, vector<16x512xbf16>
      tpu.vector_store %arg6[%c0_18, %c0_19], %29 {strides = array<i32>} : memref<16x512xbf16, #tpu.memory_space<vmem>>, vector<16x512xbf16>,
    } else {
    }
    return
  }
  func.func @transform_0(%arg0: i32, %arg1: i32, %arg2: i32) -> (i32, i32) {
    %c0_i32 = arith.constant 0 : i32
    return %arg0, %arg2 : i32, i32
  }
  func.func @transform_1(%arg0: i32, %arg1: i32, %arg2: i32) -> (i32, i32) {
    %c0_i32 = arith.constant 0 : i32
    return %arg2, %arg1 : i32, i32
  }
  func.func @transform_2(%arg0: i32, %arg1: i32, %arg2: i32) -> (i32, i32) {
    %c0_i32 = arith.constant 0 : i32
    %c0_i32_0 = arith.constant 0 : i32
    return %c0_i32, %arg1 : i32, i32
  }
  func.func @transform_3(%arg0: i32, %arg1: i32, %arg2: i32) -> (i32, i32) {
    %c0_i32 = arith.constant 0 : i32
    return %arg0, %arg1 : i32, i32
  }
}

module attributes {stable_mosaic.version = 11 : i64} {
  func.func @_linear_res_ln_kernel(%arg0: i32, %arg1: i32, %arg2: memref<16x512xbf16, #tpu.memory_space<vmem>>, %arg3: memref<512x128xbf16, #tpu.memory_space<vmem>>, %arg4: memref<1x128xf32, #tpu.memory_space<vmem>>, %arg5: memref<16x128xbf16, #tpu.memory_space<vmem>>, %arg6: memref<1x128xf32, #tpu.memory_space<vmem>>, %arg7: memref<1x128xf32, #tpu.memory_space<vmem>>, %arg8: memref<16x128xbf16, #tpu.memory_space<vmem>>, %arg9: memref<16x128xf32, #tpu.memory_space<vmem>>) attributes {dimension_semantics = [#tpu.dimension_semantics<parallel>, #tpu.dimension_semantics<arbitrary>], iteration_bounds = array<i64: 1, 1>, scalar_prefetch = 0 : i64, scratch_operands = 1 : i64, tpu.core_type = #tpu.core_type<tc>, window_params = [{transform_indices = @transform_0, window_bounds = array<i64: 16, 512>}, {transform_indices = @transform_1, window_bounds = array<i64: 512, 128>}, {pipeline_mode = #tpu.pipeline_mode<synchronous>, transform_indices = @transform_2, window_bounds = array<i64: 1, 128>}, {transform_indices = @transform_3, window_bounds = array<i64: 16, 128>}, {pipeline_mode = #tpu.pipeline_mode<synchronous>, transform_indices = @transform_4, window_bounds = array<i64: 1, 128>}, {pipeline_mode = #tpu.pipeline_mode<synchronous>, transform_indices = @transform_5, window_bounds = array<i64: 1, 128>}, {transform_indices = @transform_6, window_bounds = array<i64: 16, 128>}]} {
    %c0_i32 = arith.constant 0 : i32
    %0 = arith.cmpi eq, %arg1, %c0_i32 : i32
    %1 = arith.extui %0 : i1 to i32
    %c0_i32_0 = arith.constant 0 : i32
    %2 = arith.cmpi ne, %1, %c0_i32_0 : i32
    scf.if %2 {
      %cst_10 = arith.constant 0.000000e+00 : f32
      %12 = vector.broadcast %cst_10 : f32 to vector<16x128xf32>
      %c0_11 = arith.constant 0 : index
      %c0_12 = arith.constant 0 : index
      %13 = vector.load %arg9[%c0_11, %c0_12] : memref<16x128xf32, #tpu.memory_space<vmem>>, vector<16x128xf32>
      tpu.vector_store %arg9[%c0_11, %c0_12], %12 {strides = array<i32>} : memref<16x128xf32, #tpu.memory_space<vmem>>, vector<16x128xf32>,
    } else {
    }
    %c0 = arith.constant 0 : index
    %c0_1 = arith.constant 0 : index
    %3 = vector.load %arg9[%c0, %c0_1] : memref<16x128xf32, #tpu.memory_space<vmem>>, vector<16x128xf32>
    %c0_2 = arith.constant 0 : index
    %c0_3 = arith.constant 0 : index
    %4 = vector.load %arg2[%c0_2, %c0_3] : memref<16x512xbf16, #tpu.memory_space<vmem>>, vector<16x512xbf16>
    %c0_4 = arith.constant 0 : index
    %c0_5 = arith.constant 0 : index
    %5 = vector.load %arg3[%c0_4, %c0_5] : memref<512x128xbf16, #tpu.memory_space<vmem>>, vector<512x128xbf16>
    %cst = arith.constant dense<0.000000e+00> : vector<16x128xf32>
    %6 = tpu.matmul %4, %5, %cst {dimension_numbers = #tpu.dot_dimension_numbers<[1], [0], [0], [1], [0, 0, 1, 1], [], []>} : vector<16x512xbf16>, vector<512x128xbf16>, vector<16x128xf32> -> vector<16x128xf32>
    %7 = arith.addf %3, %6 : vector<16x128xf32>
    %c0_6 = arith.constant 0 : index
    %c0_7 = arith.constant 0 : index
    %8 = vector.load %arg9[%c0_6, %c0_7] : memref<16x128xf32, #tpu.memory_space<vmem>>, vector<16x128xf32>
    tpu.vector_store %arg9[%c0_6, %c0_7], %7 {strides = array<i32>} : memref<16x128xf32, #tpu.memory_space<vmem>>, vector<16x128xf32>,
    %c0_i32_8 = arith.constant 0 : i32
    %9 = arith.cmpi eq, %arg1, %c0_i32_8 : i32
    %10 = arith.extui %9 : i1 to i32
    %c0_i32_9 = arith.constant 0 : i32
    %11 = arith.cmpi ne, %10, %c0_i32_9 : i32
    scf.if %11 {
      %c0_10 = arith.constant 0 : index
      %c0_11 = arith.constant 0 : index
      %12 = vector.load %arg9[%c0_10, %c0_11] : memref<16x128xf32, #tpu.memory_space<vmem>>, vector<16x128xf32>
      %c0_12 = arith.constant 0 : index
      %c0_13 = arith.constant 0 : index
      %13 = vector.load %arg4[%c0_12, %c0_13] : memref<1x128xf32, #tpu.memory_space<vmem>>, vector<1x128xf32>
      %14 = vector.broadcast %13 : vector<1x128xf32> to vector<16x128xf32>
      %15 = arith.addf %12, %14 : vector<16x128xf32>
      %c0_14 = arith.constant 0 : index
      %c0_15 = arith.constant 0 : index
      %16 = vector.load %arg5[%c0_14, %c0_15] : memref<16x128xbf16, #tpu.memory_space<vmem>>, vector<16x128xbf16>
      %17 = arith.extf %16 : vector<16x128xbf16> to vector<16x128xf32>
      %18 = arith.addf %15, %17 : vector<16x128xf32>
      %cst_16 = arith.constant dense<0.000000e+00> : vector<16xf32>
      %19 = vector.multi_reduction <add>, %18, %cst_16 [1] : vector<16x128xf32> to vector<16xf32>
      %20 = vector.shape_cast %19 : vector<16xf32> to vector<16x1xf32>
      %cst_17 = arith.constant 1.280000e+02 : f32
      %21 = vector.broadcast %cst_17 : f32 to vector<16x1xf32>
      %22 = arith.divf %20, %21 : vector<16x1xf32>
      %23 = vector.broadcast %22 : vector<16x1xf32> to vector<16x128xf32>
      %24 = arith.subf %18, %23 : vector<16x128xf32>
      %25 = arith.mulf %24, %24 : vector<16x128xf32>
      %cst_18 = arith.constant dense<0.000000e+00> : vector<16xf32>
      %26 = vector.multi_reduction <add>, %25, %cst_18 [1] : vector<16x128xf32> to vector<16xf32>
      %27 = vector.shape_cast %26 : vector<16xf32> to vector<16x1xf32>
      %cst_19 = arith.constant 1.280000e+02 : f32
      %28 = vector.broadcast %cst_19 : f32 to vector<16x1xf32>
      %29 = arith.divf %27, %28 : vector<16x1xf32>
      %cst_20 = arith.constant 9.99999996E-13 : f32
      %30 = vector.broadcast %cst_20 : f32 to vector<16x1xf32>
      %31 = arith.addf %29, %30 : vector<16x1xf32>
      %32 = math.rsqrt %31 : vector<16x1xf32>
      %33 = vector.broadcast %32 : vector<16x1xf32> to vector<16x128xf32>
      %34 = arith.mulf %24, %33 : vector<16x128xf32>
      %c0_21 = arith.constant 0 : index
      %c0_22 = arith.constant 0 : index
      %35 = vector.load %arg6[%c0_21, %c0_22] : memref<1x128xf32, #tpu.memory_space<vmem>>, vector<1x128xf32>
      %36 = vector.broadcast %35 : vector<1x128xf32> to vector<16x128xf32>
      %37 = arith.mulf %34, %36 : vector<16x128xf32>
      %c0_23 = arith.constant 0 : index
      %c0_24 = arith.constant 0 : index
      %38 = vector.load %arg7[%c0_23, %c0_24] : memref<1x128xf32, #tpu.memory_space<vmem>>, vector<1x128xf32>
      %39 = vector.broadcast %38 : vector<1x128xf32> to vector<16x128xf32>
      %40 = arith.addf %37, %39 : vector<16x128xf32>
      %41 = arith.truncf %40 : vector<16x128xf32> to vector<16x128xbf16>
      %c0_25 = arith.constant 0 : index
      %c0_26 = arith.constant 0 : index
      %42 = vector.load %arg8[%c0_25, %c0_26] : memref<16x128xbf16, #tpu.memory_space<vmem>>, vector<16x128xbf16>
      tpu.vector_store %arg8[%c0_25, %c0_26], %41 {strides = array<i32>} : memref<16x128xbf16, #tpu.memory_space<vmem>>, vector<16x128xbf16>,
    } else {
    }
    return
  }
  func.func @transform_0(%arg0: i32, %arg1: i32) -> (i32, i32) {
    %c0_i32 = arith.constant 0 : i32
    return %arg0, %arg1 : i32, i32
  }
  func.func @transform_1(%arg0: i32, %arg1: i32) -> (i32, i32) {
    %c0_i32 = arith.constant 0 : i32
    %c0_i32_0 = arith.constant 0 : i32
    return %arg1, %c0_i32 : i32, i32
  }
  func.func @transform_2(%arg0: i32, %arg1: i32) -> (i32, i32) {
    %c0_i32 = arith.constant 0 : i32
    %c0_i32_0 = arith.constant 0 : i32
    %c0_i32_1 = arith.constant 0 : i32
    return %c0_i32, %c0_i32_0 : i32, i32
  }
  func.func @transform_3(%arg0: i32, %arg1: i32) -> (i32, i32) {
    %c0_i32 = arith.constant 0 : i32
    %c0_i32_0 = arith.constant 0 : i32
    return %arg0, %c0_i32 : i32, i32
  }
  func.func @transform_4(%arg0: i32, %arg1: i32) -> (i32, i32) {
    %c0_i32 = arith.constant 0 : i32
    %c0_i32_0 = arith.constant 0 : i32
    %c0_i32_1 = arith.constant 0 : i32
    return %c0_i32, %c0_i32_0 : i32, i32
  }
  func.func @transform_5(%arg0: i32, %arg1: i32) -> (i32, i32) {
    %c0_i32 = arith.constant 0 : i32
    %c0_i32_0 = arith.constant 0 : i32
    %c0_i32_1 = arith.constant 0 : i32
    return %c0_i32, %c0_i32_0 : i32, i32
  }
  func.func @transform_6(%arg0: i32, %arg1: i32) -> (i32, i32) {
    %c0_i32 = arith.constant 0 : i32
    %c0_i32_0 = arith.constant 0 : i32
    return %arg0, %c0_i32 : i32, i32
  }
}

</mosaic_0001>

<bundles_post_ra>
// kernel: bert_model_two.11
= control target key start
LH: loop header
LB: loop body
LE: loop exit
PB: predicated region body
PF: predicated region fallthrough
CT: control target
= control target key end

     0   :  { %s121_s0 = inlined_call_operand.vmem [shape: f32[16,128], index: 0, kind: input, shape index: {}]   ;;  %s122_s1 = inlined_call_operand.vmem [shape: f32[1,128], index: 1, kind: input, shape index: {}]   ;;  %s123_s2 = inlined_call_operand.vmem [shape: f32[1,128], index: 2, kind: input, shape index: {}]   ;;  %s124_s3 = inlined_call_operand.vmem [shape: bf16[16,128], index: 3, kind: output, shape index: {}]  }
   0x1   :  { %v14_v0 = vld [vmem:[%s121_s0] sm:$0xff]  ;;  %v15_v1 = vld [vmem:[%s121_s0 + $0x8] sm:$0xff] }
   0x2   :  { %16 = vadd.xlane.f32.xlu0 %v14_v0  ;;  %v71_v18 = vld [vmem:[%s122_s1] ss:$0 sm:$0xff] }
   0x3   :  { %v72_v22 = vld [vmem:[%s123_s2] ss:$0 sm:$0xff] }
   0x6   :  { %18 = vadd.xlane.f32.xlu0 %v15_v1 }
  0x8f   :  { %v17_v2 = vpop.xlane.xlu0 %16 }
  0x90   :  { %v21_v3 = vmul.f32 0.0078125, %v17_v2 }
  0x92   :  { %v23_v4 = vsub.f32 %v14_v0, %v21_v3 }
  0x93   :  { %v19_v5 = vpop.xlane.xlu0 %18 }
  0x94   :  { %v22_v6 = vmul.f32 0.0078125, %v19_v5  ;;  %v25_v7 = vmul.f32 %v23_v4, %v23_v4 }
  0x96   :  { %v24_v8 = vsub.f32 %v15_v1, %v22_v6  ;;  %27 = vadd.xlane.f32.xlu1 %v25_v7 }
  0x98   :  { %v26_v9 = vmul.f32 %v24_v8, %v24_v8 }
  0x9a   :  { %29 = vadd.xlane.f32.xlu1 %v26_v9 }
 0x123   :  { %v28_v10 = vpop.xlane.xlu1 %27 }
 0x124   :  { %v31_v11 = vmul.f32 0.0078125, %v28_v10 }
 0x126   :  { %v33_v12 = vadd.f32 1e-12, %v31_v11 }
 0x127   :  { %v30_v13 = vpop.xlane.xlu1 %29 }
 0x128   :  { %82 = vrsqrt.f32 %v33_v12  ;;  %v32_v14 = vmul.f32 0.0078125, %v30_v13 }
 0x12a   :  { %v34_v15 = vadd.f32 1e-12, %v32_v14 }
 0x12c   :  { %84 = vrsqrt.f32 %v34_v15 }
 0x132   :  { %v83_v16 = vpop.eup %82 }
 0x133   :  { %v37_v17 = vmul.f32 %v83_v16, %v23_v4 }
 0x135   :  { %v46_v20 = vmul.f32 %v71_v18, %v37_v17 }
 0x136   :  { %v85_v19 = vpop.eup %84 }
 0x137   :  { %v38_v21 = vmul.f32 %v85_v19, %v24_v8  ;;  %v55_v24 = vadd.f32 %v72_v22, %v46_v20 }
 0x139   :  { %v47_v23 = vmul.f32 %v71_v18, %v38_v21 }
 0x13b   :  { %v56_v25 = vadd.f32 %v72_v22, %v47_v23 }
 0x13d   :  { %v80_v26 = vpack.c.bf16 %v56_v25, %v55_v24 }
 0x13f   :  { %81 = vst [vmem:[%s124_s3] sm:$0xff] %v80_v26  }

// kernel: bert_model_two.14
= control target key start
LH: loop header
LB: loop body
LE: loop exit
PB: predicated region body
PF: predicated region fallthrough
CT: control target
= control target key end

     0   :  { %v293_v0 = vmov 0.0   ;;  %vm294_vm0 = vmmov 0   ;;  %s372_s1 = inlined_call_operand.vmem [shape: bf16[128,128], index: 1, kind: input, shape index: {}]   ;;  %s373_s0 = inlined_call_operand.vmem [shape: bf16[16,128], index: 0, kind: input, shape index: {}]   ;;  %s374_s3 = inlined_call_operand.vmem [shape: bf16[16,128], index: 3, kind: input, shape index: {}]   ;;  %s375_s2 = inlined_call_operand.vmem [shape: f32[1,128], index: 2, kind: input, shape index: {}]   ;;  %s376_s4 = inlined_call_operand.vmem [shape: f32[1,128], index: 4, kind: input, shape index: {}]   ;;  %s377_s5 = inlined_call_operand.vmem [shape: f32[1,128], index: 5, kind: input, shape index: {}]   ;;  %s378_s6 = inlined_call_operand.vmem [shape: bf16[16,128], index: 6, kind: output, shape index: {}]  }
   0x1   :  { %258 = vmatprep.subr.bf16.mxu0 %v293_v0  ;;  %v280_v1 = vld [vmem:[%s372_s1] sm:$0xff]   ;;  %274 = vmatprep.mubr.msk.bf16.mxu0 %vm294_vm0, %v293_v0  ;;  %v281_v2 = vld [vmem:[%s372_s1 + $0x8] sm:$0xff]   ;;  %v282_v3 = vld [vmem:[%s372_s1 + $0x10] sm:$0xff]  }
   0x2   :  { %259 = vmatpush3.bf16.msra.mxu0 %v280_v1  ;;  %v283_v4 = vld [vmem:[%s372_s1 + $0x18] sm:$0xff]   ;;  %v284_v5 = vld [vmem:[%s372_s1 + $0x20] sm:$0xff]   ;;  %v285_v6 = vld [vmem:[%s372_s1 + $0x28] sm:$0xff]  }
   0x3   :  { %260 = vmatprep.subr.bf16.mxu0 %v293_v0  ;;  %v286_v7 = vld [vmem:[%s372_s1 + $0x30] sm:$0xff]   ;;  %v287_v8 = vld [vmem:[%s372_s1 + $0x38] sm:$0xff]   ;;  %v288_v9 = vld [vmem:[%s373_s0] sm:$0xff]  }
   0x4   :  { %v241_v10 = vld [vmem:[%s374_s3] sm:$0xff]  }
   0x5   :  { %v233_v11 = vld [vmem:[%s375_s2] ss:$0 sm:$0xff]  ;;  %v242_v12 = vunpack.c.l.bf16 %v241_v10  ;;  %v243_v20 = vunpack.c.h.bf16 %v241_v10 }
   0x6   :  { %261 = vmatpush3.bf16.msra.mxu0 %v281_v2  ;;  %v234_v38 = vld [vmem:[%s376_s4] ss:$0 sm:$0xff] }
   0x7   :  { %262 = vmatprep.subr.bf16.mxu0 %v293_v0  ;;  %v235_v42 = vld [vmem:[%s377_s5] ss:$0 sm:$0xff] }
   0xa   :  { %263 = vmatpush3.bf16.msra.mxu0 %v282_v3 }
   0xb   :  { %264 = vmatprep.subr.bf16.mxu0 %v293_v0 }
   0xe   :  { %265 = vmatpush3.bf16.msra.mxu0 %v283_v4 }
   0xf   :  { %266 = vmatprep.subr.bf16.mxu0 %v293_v0 }
  0x12   :  { %267 = vmatpush3.bf16.msra.mxu0 %v284_v5 }
  0x13   :  { %268 = vmatprep.subr.bf16.mxu0 %v293_v0 }
  0x16   :  { %269 = vmatpush3.bf16.msra.mxu0 %v285_v6 }
  0x17   :  { %270 = vmatprep.subr.bf16.mxu0 %v293_v0 }
  0x1a   :  { %271 = vmatpush3.bf16.msra.mxu0 %v286_v7 }
  0x1b   :  { %272 = vmatprep.subr.bf16.mxu0 %v293_v0 }
  0x1e   :  { %273 = vmatpush3.bf16.msra.mxu0 %v287_v8 }
  0x21   :  { %275 = vmatmul.mubr.bf16.vlgmr.msra.gmra.mrb[0].mxu0 %v288_v9 }
  0xf4   :  { %v138_v13 = vpop.f32.mrb[0].mxu0 }
  0xf5   :  { %v161_v14 = vadd.f32 %v233_v11, %v138_v13  ;;  %v276_v15 = vpop.f32.mrb[1].mxu0 }
  0xf6   :  { %v141_v16 = vpop.f32.mrb[2].mxu0 }
  0xf7   :  { %v162_v17 = vadd.f32 %v233_v11, %v141_v16  ;;  %v277_v18 = vpop.f32.mrb[3].mxu0  ;;  %v167_v19 = vadd.f32 %v242_v12, %v161_v14 }
  0xf9   :  { %169 = vadd.xlane.f32.xlu0 %v167_v19  ;;  %v168_v21 = vadd.f32 %v243_v20, %v162_v17 }
  0xfd   :  { %171 = vadd.xlane.f32.xlu0 %v168_v21 }
 0x186   :  { %v170_v22 = vpop.xlane.xlu0 %169 }
 0x187   :  { %v174_v23 = vmul.f32 0.0078125, %v170_v22 }
 0x189   :  { %v176_v24 = vsub.f32 %v167_v19, %v174_v23 }
 0x18a   :  { %v172_v25 = vpop.xlane.xlu0 %171 }
 0x18b   :  { %v175_v26 = vmul.f32 0.0078125, %v172_v25  ;;  %v178_v27 = vmul.f32 %v176_v24, %v176_v24 }
 0x18d   :  { %v177_v28 = vsub.f32 %v168_v21, %v175_v26  ;;  %180 = vadd.xlane.f32.xlu1 %v178_v27 }
 0x18f   :  { %v179_v29 = vmul.f32 %v177_v28, %v177_v28 }
 0x191   :  { %182 = vadd.xlane.f32.xlu1 %v179_v29 }
 0x21a   :  { %v181_v30 = vpop.xlane.xlu1 %180 }
 0x21b   :  { %v184_v31 = vmul.f32 0.0078125, %v181_v30 }
 0x21d   :  { %v186_v32 = vadd.f32 1e-12, %v184_v31 }
 0x21e   :  { %v183_v33 = vpop.xlane.xlu1 %182 }
 0x21f   :  { %289 = vrsqrt.f32 %v186_v32  ;;  %v185_v34 = vmul.f32 0.0078125, %v183_v33 }
 0x221   :  { %v187_v35 = vadd.f32 1e-12, %v185_v34 }
 0x223   :  { %291 = vrsqrt.f32 %v187_v35 }
 0x229   :  { %v290_v36 = vpop.eup %289 }
 0x22a   :  { %v190_v37 = vmul.f32 %v290_v36, %v176_v24 }
 0x22c   :  { %v199_v40 = vmul.f32 %v234_v38, %v190_v37 }
 0x22d   :  { %v292_v39 = vpop.eup %291 }
 0x22e   :  { %v191_v41 = vmul.f32 %v292_v39, %v177_v28  ;;  %v208_v44 = vadd.f32 %v235_v42, %v199_v40 }
 0x230   :  { %v200_v43 = vmul.f32 %v234_v38, %v191_v41 }
 0x232   :  { %v209_v45 = vadd.f32 %v235_v42, %v200_v43 }
 0x234   :  { %v247_v46 = vpack.c.bf16 %v209_v45, %v208_v44 }
 0x236   :  { %248 = vst [vmem:[%s378_s6] sm:$0xff] %v247_v46  }

// kernel: bert_model_two.12
= control target key start
LH: loop header
LB: loop body
LE: loop exit
PB: predicated region body
PF: predicated region fallthrough
CT: control target
= control target key end

     0   :  { %v453_v0 = vmov 0.0   ;;  %vm454_vm0 = vmmov 0   ;;  %v455_v3 = vmov 0   ;;  %v306_v27 = vlaneseq  ;;  %s566_s1 = inlined_call_operand.vmem [shape: bf16[128,384], index: 1, kind: input, shape index: {}]   ;;  %s567_s0 = inlined_call_operand.vmem [shape: bf16[16,128], index: 0, kind: input, shape index: {}]   ;;  %s568_s2 = inlined_call_operand.vmem [shape: f32[1,384], index: 2, kind: input, shape index: {}]   ;;  %s569_s3 = inlined_call_operand.vmem [shape: bf16[16,384], index: 3, kind: output, shape index: {}]  }
   0x1   :  { %397 = vmatprep.subr.bf16.mxu1 %v453_v0  ;;  %v420_v1 = vld [vmem:[%s566_s1 + $0x4] ss:$12 sps:$4 sm:$0xff]   ;;  %413 = vmatprep.mubr.msk.bf16.mxu1 %vm454_vm0, %v453_v0  ;;  %v422_v2 = vld [vmem:[%s566_s1 + $0x8] ss:$12 sps:$4 sm:$0xff]   ;;  %v423_v4 = vld [vmem:[%s566_s1] ss:$12 sps:$4 sm:$0xff]  }
   0x2   :  { %231 = vmatprep.mubr.bf16.mxu0 %v455_v3  ;;  %199 = vmatprep.subr.bf16.mxu0 %v420_v1  ;;  %v424_v5 = vld [vmem:[%s566_s1 + $0x1c] ss:$12 sps:$4 sm:$0xff]   ;;  %v426_v6 = vld [vmem:[%s566_s1 + $0x20] ss:$12 sps:$4 sm:$0xff]   ;;  %v427_v7 = vld [vmem:[%s566_s1 + $0x18] ss:$12 sps:$4 sm:$0xff]  }
   0x3   :  { %398 = vmatpush3.bf16.msra.mxu1 %v422_v2  ;;  %200 = vmatpush1.bf16.msra.mxu0 %v423_v4  ;;  %v428_v8 = vld [vmem:[%s566_s1 + $0x34] ss:$12 sps:$4 sm:$0xff]   ;;  %v430_v9 = vld [vmem:[%s566_s1 + $0x38] ss:$12 sps:$4 sm:$0xff]   ;;  %v431_v10 = vld [vmem:[%s566_s1 + $0x30] ss:$12 sps:$4 sm:$0xff]  }
   0x4   :  { %399 = vmatprep.subr.bf16.mxu1 %v453_v0  ;;  %201 = vmatprep.subr.bf16.mxu0 %v424_v5  ;;  %v432_v11 = vld [vmem:[%s566_s1 + $0x4c] ss:$12 sps:$4 sm:$0xff]   ;;  %v434_v12 = vld [vmem:[%s566_s1 + $0x50] ss:$12 sps:$4 sm:$0xff]   ;;  %v435_v13 = vld [vmem:[%s566_s1 + $0x48] ss:$12 sps:$4 sm:$0xff]  }
   0x5   :  { %v436_v14 = vld [vmem:[%s566_s1 + $0x64] ss:$12 sps:$4 sm:$0xff]   ;;  %v438_v15 = vld [vmem:[%s566_s1 + $0x68] ss:$12 sps:$4 sm:$0xff]   ;;  %v439_v16 = vld [vmem:[%s566_s1 + $0x60] ss:$12 sps:$4 sm:$0xff]  }
   0x6   :  { %v440_v17 = vld [vmem:[%s566_s1 + $0x7c] ss:$12 sps:$4 sm:$0xff]   ;;  %v442_v18 = vld [vmem:[%s566_s1 + $0x80] ss:$12 sps:$4 sm:$0xff]   ;;  %v443_v19 = vld [vmem:[%s566_s1 + $0x78] ss:$12 sps:$4 sm:$0xff]  }
   0x7   :  { %400 = vmatpush3.bf16.msra.mxu1 %v426_v6  ;;  %202 = vmatpush1.bf16.msra.mxu0 %v427_v7  ;;  %v444_v20 = vld [vmem:[%s566_s1 + $0x94] ss:$12 sps:$4 sm:$0xff]   ;;  %v446_v21 = vld [vmem:[%s566_s1 + $0x98] ss:$12 sps:$4 sm:$0xff]   ;;  %v447_v22 = vld [vmem:[%s566_s1 + $0x90] ss:$12 sps:$4 sm:$0xff]  }
   0x8   :  { %401 = vmatprep.subr.bf16.mxu1 %v453_v0  ;;  %203 = vmatprep.subr.bf16.mxu0 %v428_v8  ;;  %v448_v23 = vld [vmem:[%s566_s1 + $0xac] ss:$12 sps:$4 sm:$0xff]   ;;  %v450_v24 = vld [vmem:[%s566_s1 + $0xb0] ss:$12 sps:$4 sm:$0xff]   ;;  %v451_v25 = vld [vmem:[%s566_s1 + $0xa8] ss:$12 sps:$4 sm:$0xff]  }
   0x9   :  { %v452_v26 = vld [vmem:[%s567_s0] sm:$0xff]   ;;  %v307_v28 = vshrl.u32 %v306_v27, 7 }
   0xa   :  { %v304_v30 = vld [vmem:[%s568_s2] sm:$0x7] }
   0xb   :  { %402 = vmatpush3.bf16.msra.mxu1 %v430_v9  ;;  %204 = vmatpush1.bf16.msra.mxu0 %v431_v10  ;;  %v316_v29 = vsub.s32 2, %v307_v28  ;;  %v308_v31 = vsub.s32 0, %v307_v28  ;;  %v312_v32 = vsub.s32 1, %v307_v28 }
   0xc   :  { %403 = vmatprep.subr.bf16.mxu1 %v453_v0  ;;  %205 = vmatprep.subr.bf16.mxu0 %v432_v11 }
   0xd   :  { %v317_v33 = vrot.slane %v304_v30, %v316_v29  ;;  %v309_v34 = vrot.slane %v304_v30, %v308_v31  ;;  %v313_v35 = vrot.slane %v304_v30, %v312_v32 }
   0xf   :  { %404 = vmatpush3.bf16.msra.mxu1 %v434_v12  ;;  %206 = vmatpush1.bf16.msra.mxu0 %v435_v13 }
  0x10   :  { %405 = vmatprep.subr.bf16.mxu1 %v453_v0  ;;  %207 = vmatprep.subr.bf16.mxu0 %v436_v14 }
  0x13   :  { %406 = vmatpush3.bf16.msra.mxu1 %v438_v15  ;;  %208 = vmatpush1.bf16.msra.mxu0 %v439_v16 }
  0x14   :  { %407 = vmatprep.subr.bf16.mxu1 %v453_v0  ;;  %209 = vmatprep.subr.bf16.mxu0 %v440_v17 }
  0x17   :  { %408 = vmatpush3.bf16.msra.mxu1 %v442_v18  ;;  %210 = vmatpush1.bf16.msra.mxu0 %v443_v19 }
  0x18   :  { %409 = vmatprep.subr.bf16.mxu1 %v453_v0  ;;  %211 = vmatprep.subr.bf16.mxu0 %v444_v20 }
  0x1b   :  { %410 = vmatpush3.bf16.msra.mxu1 %v446_v21  ;;  %212 = vmatpush1.bf16.msra.mxu0 %v447_v22 }
  0x1c   :  { %411 = vmatprep.subr.bf16.mxu1 %v453_v0  ;;  %213 = vmatprep.subr.bf16.mxu0 %v448_v23 }
  0x1f   :  { %412 = vmatpush3.bf16.msra.mxu1 %v450_v24  ;;  %214 = vmatpush1.bf16.msra.mxu0 %v451_v25 }
  0x22   :  { %414 = vmatmul.mubr.bf16.vlgmr.msra.gmra.mrb[0].mxu1 %v452_v26  ;;  %232 = vmatmul.mubr.bf16.vlgmr.msra.gmra.mrb[0].mxu0 %v452_v26 }
  0xf5   :  { %v276_v36 = vpop.f32.mrb[0].mxu1  ;;  %v233_v38 = vpop.f32.mrb[0].mxu0 }
  0xf6   :  { %v323_v37 = vadd.f32 %v317_v33, %v276_v36  ;;  %v415_v39 = vpop.f32.mrb[1].mxu1  ;;  %v321_v40 = vadd.f32 %v309_v34, %v233_v38  ;;  %v235_v41 = vpop.f32.mrb[1].mxu0 }
  0xf7   :  { %v279_v42 = vpop.f32.mrb[2].mxu1  ;;  %v322_v44 = vadd.f32 %v313_v35, %v235_v41  ;;  %v237_v46 = vpop.f32.mrb[2].mxu0 }
  0xf8   :  { %v385_v43 = vpack.c.bf16 %v323_v37, %v323_v37  ;;  %v326_v45 = vadd.f32 %v317_v33, %v279_v42  ;;  %v416_v47 = vpop.f32.mrb[3].mxu1  ;;  %v324_v48 = vadd.f32 %v309_v34, %v237_v46  ;;  %v239_v49 = vpop.f32.mrb[3].mxu0 }
  0xf9   :  { %v384_v50 = vpack.c.bf16 %v322_v44, %v321_v40  ;;  %v325_v52 = vadd.f32 %v313_v35, %v239_v49 }
  0xfa   :  { %348 = vst [vmem:[%s569_s3 + $0x8] sm:$0xf] %v385_v43  ;;  %v387_v51 = vpack.c.bf16 %v326_v45, %v326_v45 }
  0xfb   :  { %347 = vst [vmem:[%s569_s3] sm:$0xff] %v384_v50  ;;  %v386_v53 = vpack.c.bf16 %v325_v52, %v324_v48 }
  0xfc   :  { %350 = vst [vmem:[%s569_s3 + $0x14] sm:$0xf] %v387_v51 }
  0xfd   :  { %349 = vst [vmem:[%s569_s3 + $0xc] sm:$0xff] %v386_v53 }

// kernel: bert_model_two.13
= control target key start
LH: loop header
LB: loop body
LE: loop exit
PB: predicated region body
PF: predicated region fallthrough
CT: control target
= control target key end

     0   :  { %s1159_s15 = smov 0   ;;  %s1161_s16 = smov 0   ;;  %s1286_s0 = inlined_call_operand.vmem [shape: bf16[2,8,384], index: 0, kind: input, shape index: {}, may-alias: {0,1,2}]   ;;  %s1287_s1 = inlined_call_operand.vmem [shape: bf16[2,8,384], index: 1, kind: input, shape index: {}, may-alias: {0,1,2}]   ;;  %s1288_s2 = inlined_call_operand.vmem [shape: bf16[2,8,384], index: 2, kind: input, shape index: {}, may-alias: {0,1,2}]   ;;  %s1289_s3 = inlined_call_operand.vmem [shape: f32[2,1,8], index: 3, kind: input, shape index: {}]   ;;  %s1290_s4 = inlined_call_operand.vmem [shape: bf16[2,8,128], index: 4, kind: output, shape index: {}]  }
   0x1   :  { %s1163_s17 = smov 0  }
   0x2 LB: > { %s33_s18 = sadd.s32 1, %s1123_s16  ;;  %p967_p0 = scmp.ge.s32.totalorder %s1127_s17, 1  ;;  %s1127_s17 = sphi %s1163_s17, %s14_s17   ;;  %s1123_s16 = sphi %s1161_s16, %s1292_s16   ;;  %s1119_s15 = sphi %s1159_s15, %s1291_s15  }
   0x3   : > { %p35_p1 = scmp.ge.s32.totalorder %s33_s18, 2  ;;  %p242_p2 = scmp.lt.s32.totalorder %s1127_s17, 3 }
   0x5   : > { %s1294_s18 = smov (%p35_p1, %s33_s18), 0  ;;  %p243_p3 = pnand %p967_p0, %p242_p2 }
   0x6   : > { %p301_p4 = scmp.lt.s32.totalorder (!%p243_p3), %s1119_s15, 1  ;;  %v1129_v0 = vmov (!%p243_p3), 0.0   ;;  %vm1130_vm0 = vmmov (!%p243_p3), 0   ;;  %vm357_vm1 = vcmask (!%p243_p3), 261120   ;;  %vm404_vm2 = vcmask (!%p243_p3), 64512   ;;  %s1131_s30 = smov (!%p243_p3), 96  }
   0x7   : > { %246 = sbr.rel (%p243_p3) target bundleno = 1480 (0x5c8), region = 36  ;;  %1006 = vmatprep.subr.bf16.mxu0 (!%p243_p3), %v1129_v0  ;;  %1008 = vmatprep.mubr.msk.bf16.mxu0 (!%p243_p3), %vm1130_vm0, %v1129_v0  ;;  %s1132_s5 = smov (!%p243_p3), 64   ;;  %vm420_vm3 = vcmask (!%p243_p3), 1043456   ;;  %vm816_vm4 = vcmask (!%p243_p3), 523264   ;;  %vm818_vm5 = vcmask (!%p243_p3), 785408  }
   0x8   : > { %1012 = vmatprep.subr.bf16.mxu1 (!%p243_p3), %v1129_v0  ;;  %1014 = vmatprep.mubr.msk.bf16.mxu1 (!%p243_p3), %vm1130_vm0, %v1129_v0  ;;  %s1133_s6 = smov (!%p243_p3), 32  }
   0xe   : > { %s1296_s15 = smov (!%p301_p4, %s1119_s15), 1 }
   0xf   : > { %s1186_s19 = smul.u32 12, %s1296_s15  ;;  %s335_s29 = scalar_lea.vmem %s1289_s3, %s1296_s15 }
  0x10   : > { %v1205_v4 = vld [vmem:[%s335_s29] ss:$0 sm:$0xff]  ;;  %s971_s11 = sshll.u32 %s1296_s15, 2 }
  0x11   : > { %s987_s20 = sadd.s32 4, %s1186_s19  ;;  %s312_s26 = scalar_lea.vmem %s1286_s0, %s1186_s19 }
  0x12   : > { %s321_s23 = scalar_lea.vmem %s1287_s1, %s987_s20  ;;  %v348_v3 = vld [vmem:[%s312_s26] sm:$0xf]  ;;  %s989_s7 = sadd.s32 8, %s1186_s19 }
  0x13   : > { %v349_v1 = vld [vmem:[%s321_s23] sm:$0xf]  ;;  %v975_v12 = vcombine.low %v348_v3, %v348_v3  ;;  %s331_s10 = scalar_lea.vmem %s1288_s2, %s989_s7  ;;  %s345_s14 = scalar_lea.vmem %s1290_s4, %s971_s11 }
  0x14   : > { %v362_v2 = vsel %vm357_vm1, %v349_v1, 0  ;;  %v976_v11 = vcombine.low %v349_v1, %v349_v1  ;;  %v1219_v18 = vld [vmem:[%s331_s10] sm:$0xf] }
  0x15   : > { %1007 = vmatpush3.bf16.xpose.msra.mxu0 %v362_v2  ;;  %v422_v19 = vsel %vm420_vm3, %v1219_v18, 0  ;;  %v978_v2 = vcombine.low %v1219_v18, %v1219_v18 }
  0x16   : > { %1024 = vmatprep.subr.bf16.mxu0 %v1129_v0  ;;  %472 = vrot.lane.b32.xlu1 %v976_v11, %s1131_s30 }
  0x17   : > { %1013 = vmatpush3.bf16.msra.mxu1 %v422_v19 }
  0x18   : > { %1018 = vmatprep.subr.bf16.mxu1 %v1129_v0 }
  0x1a   : > { %467 = vrot.lane.b32.xlu1 %v975_v12, %s1131_s30 }
  0x1c   : > { %1009 = vmatmul.mubr.msk.bf16.vlgmr.msra.gmra.mrb[0].mxu0 %vm357_vm1, %v348_v3 }
  0x1d   : > { %1026 = vmatprep.mubr.msk.bf16.mxu0 %vm1130_vm0, %v1129_v0 }
  0x1e   : > { %583 = vrot.lane.b32.xlu1 %v975_v12, %s1132_s5 }
  0x22   : > { %695 = vrot.lane.b32.xlu1 %v976_v11, %s1133_s6 }
  0x26   : > { %693 = vrot.lane.b32.xlu1 %v975_v12, %s1133_s6 }
  0x88   : > { %v473_v22 = vpop.permute.xlu1 %472 }
  0x89   : > { %v478_v24 = vsel %vm357_vm1, %v473_v22, 0 }
  0x8c   : > { %v468_v26 = vpop.permute.xlu1 %467 }
  0x90   : > { %v584_v28 = vpop.permute.xlu1 %583 }
  0x94   : > { %v696_v30 = vpop.permute.xlu1 %695 }
  0x95   : > { %v701_v31 = vsel %vm357_vm1, %v696_v30, 0 }
  0x98   : > { %v694_v32 = vpop.permute.xlu1 %693 }
  0xef   : > { %v398_v5 = vpop.f32.mrb[0].mxu0 }
  0xf0   : > { %v399_v6 = vadd.f32 %v1205_v4, %v398_v5  ;;  %v1010_v7 = vpop.f32.mrb[1].mxu0 }
  0xf1   : > { %v401_v8 = vpop.f32.mrb[2].mxu0 }
  0xf2   : > { %v1011_v9 = vpop.f32.mrb[3].mxu0  ;;  %v405_v10 = vsel %vm404_vm2, %v399_v6, -inf }
  0xf3   : > { %406 = vmax.xlane.f32.xlu0 %v405_v10 }
 0x180   : > { %v407_v13 = vpop.xlane.xlu0 %406 }
 0x181   : > { %v408_v14 = vsub.f32 %v399_v6, %v407_v13 }
 0x183   : > { %v409_v15 = vmul.f32 1.442695, %v408_v14 }
 0x185   : > { %1089 = vpow2.f32 %v409_v15 }
 0x18f   : > { %v1090_v16 = vpop.eup %1089 }
 0x190   : > { %v411_v17 = vsel %vm404_vm2, %v1090_v16, 0.0 }
 0x191   : > { %412 = vadd.xlane.f32.xlu0 %v411_v17 }
 0x1a7   : > { %585 = vrot.lane.b32.xlu0 %v976_v11, %s1132_s5 }
 0x21e   : > { %v413_v20 = vpop.xlane.xlu0 %412 }
 0x21f   : > { %1091 = vrcp.f32 %v413_v20 }
 0x222   : > { %v586_v27 = vpop.permute.xlu0 %585 }
 0x223   : > { %v591_v29 = vsel %vm357_vm1, %v586_v27, 0 }
 0x229   : > { %v1092_v21 = vpop.eup %1091 }
 0x22a   : > { %v415_v23 = vmul.f32 %v1092_v21, %v1090_v16 }
 0x22c   : > { %v416_v25 = vpack.c.bf16 %v415_v23, %v415_v23 }
 0x22e   : > { %1015 = vmatmul.mubr.msk.bf16.vlgmr.msra.gmra.mrb[0].mxu1 %vm404_vm2, %v416_v25 }
 0x22f   : > { %1019 = vmatpush3.bf16.xpose.msra.mxu1 %v478_v24  ;;  %1020 = vmatprep.mubr.msk.bf16.mxu1 %vm1130_vm0, %v1129_v0 }
 0x230   : > { %1030 = vmatprep.subr.bf16.mxu1 %v1129_v0 }
 0x236   : > { %1021 = vmatmul.mubr.msk.bf16.vlgmr.msra.gmra.mrb[4].mxu1 %vm357_vm1, %v468_v26 }
 0x237   : > { %1031 = vmatpush3.bf16.xpose.msra.mxu1 %v591_v29  ;;  %1032 = vmatprep.mubr.msk.bf16.mxu1 %vm1130_vm0, %v1129_v0 }
 0x238   : > { %1042 = vmatprep.subr.bf16.mxu1 %v1129_v0 }
 0x23e   : > { %1033 = vmatmul.mubr.msk.bf16.vlgmr.msra.gmra.mrb[8].mxu1 %vm357_vm1, %v584_v28 }
 0x23f   : > { %1043 = vmatpush3.bf16.xpose.msra.mxu1 %v701_v31  ;;  %1044 = vmatprep.mubr.msk.bf16.mxu1 %vm1130_vm0, %v1129_v0 }
 0x246   : > { %1045 = vmatmul.mubr.msk.bf16.vlgmr.msra.gmra.mrb[12].mxu1 %vm357_vm1, %v694_v32 }
 0x301   : > { %v1240_v33 = vpop.f32.mrb[0].mxu1 }
 0x302   : > { %v1016_v34 = vpop.f32.mrb[1].mxu1 }
 0x303   : > { %v461_v35 = vpop.f32.mrb[2].mxu1 }
 0x304   : > { %v1017_v36 = vpop.f32.mrb[3].mxu1 }
 0x309   : > { %v514_v37 = vpop.f32.mrb[4].mxu1 }
 0x30a   : > { %v515_v38 = vadd.f32 %v1205_v4, %v514_v37  ;;  %v1022_v39 = vpop.f32.mrb[5].mxu1 }
 0x30b   : > { %v517_v40 = vpop.f32.mrb[6].mxu1 }
 0x30c   : > { %v1023_v41 = vpop.f32.mrb[7].mxu1  ;;  %v520_v42 = vsel %vm404_vm2, %v515_v38, -inf }
 0x30d   : > { %521 = vmax.xlane.f32.xlu1 %v520_v42 }
 0x311   : > { %v627_v43 = vpop.f32.mrb[8].mxu1 }
 0x312   : > { %v628_v44 = vadd.f32 %v1205_v4, %v627_v43  ;;  %v1034_v45 = vpop.f32.mrb[9].mxu1 }
 0x313   : > { %v630_v46 = vpop.f32.mrb[10].mxu1 }
 0x314   : > { %v633_v47 = vsel %vm404_vm2, %v628_v44, -inf  ;;  %v1035_v48 = vpop.f32.mrb[11].mxu1 }
 0x315   : > { %634 = vmax.xlane.f32.xlu0 %v633_v47 }
 0x319   : > { %v737_v49 = vpop.f32.mrb[12].mxu1 }
 0x31a   : > { %v738_v50 = vadd.f32 %v1205_v4, %v737_v49  ;;  %v1046_v51 = vpop.f32.mrb[13].mxu1 }
 0x31b   : > { %v740_v52 = vpop.f32.mrb[14].mxu1 }
 0x31c   : > { %v743_v53 = vsel %vm404_vm2, %v738_v50, -inf  ;;  %v1047_v54 = vpop.f32.mrb[15].mxu1 }
 0x31d   : > { %744 = vmax.xlane.f32.xlu1 %v743_v53 }
 0x39a   : > { %v522_v55 = vpop.xlane.xlu1 %521 }
 0x39b   : > { %v523_v56 = vsub.f32 %v515_v38, %v522_v55 }
 0x39d   : > { %v524_v57 = vmul.f32 1.442695, %v523_v56 }
 0x39f   : > { %1093 = vpow2.f32 %v524_v57 }
 0x3a2   : > { %v635_v58 = vpop.xlane.xlu0 %634 }
 0x3a3   : > { %v636_v59 = vsub.f32 %v628_v44, %v635_v58 }
 0x3a5   : > { %v637_v60 = vmul.f32 1.442695, %v636_v59 }
 0x3a7   : > { %1095 = vpow2.f32 %v637_v60 }
 0x3a9   : > { %v1094_v61 = vpop.eup %1093 }
 0x3aa   : > { %v526_v62 = vsel %vm404_vm2, %v1094_v61, 0.0  ;;  %v745_v3 = vpop.xlane.xlu1 %744 }
 0x3ab   : > { %527 = vadd.xlane.f32.xlu1 %v526_v62  ;;  %v746_v4 = vsub.f32 %v738_v50, %v745_v3 }
 0x3ad   : > { %v747_v5 = vmul.f32 1.442695, %v746_v4 }
 0x3af   : > { %1097 = vpow2.f32 %v747_v5 }
 0x3b1   : > { %v1096_v63 = vpop.eup %1095 }
 0x3b2   : > { %v639_v1 = vsel %vm404_vm2, %v1096_v63, 0.0 }
 0x3b3   : > { %640 = vadd.xlane.f32.xlu0 %v639_v1 }
 0x3b9   : > { %v1098_v6 = vpop.eup %1097 }
 0x3ba   : > { %v749_v7 = vsel %vm404_vm2, %v1098_v6, 0.0 }
 0x3bc   : > { %645 = vrot.lane.b32.xlu1 %v978_v2, %s1132_s5 }
 0x3c9   : > { %535 = vrot.lane.b32.xlu0 %v978_v2, %s1131_s30 }
 0x3e0   : > { %750 = vadd.xlane.f32.xlu1 %v749_v7 }
 0x3f1   : > { %755 = vrot.lane.b32.xlu1 %v978_v2, %s1133_s6 }
 0x438   : > { %v528_v8 = vpop.xlane.xlu1 %527 }
 0x439   : > { %1099 = vrcp.f32 %v528_v8 }
 0x43c   : > { %v646_v14 = vpop.permute.xlu1 %645 }
 0x43d   : > { %v651_v16 = vsel %vm420_vm3, %v646_v14, 0 }
 0x440   : > { %v641_v9 = vpop.xlane.xlu0 %640 }
 0x441   : > { %1101 = vrcp.f32 %v641_v9 }
 0x443   : > { %v1100_v10 = vpop.eup %1099 }
 0x444   : > { %v530_v11 = vmul.f32 %v1100_v10, %v1094_v61  ;;  %v536_v12 = vpop.permute.xlu0 %535 }
 0x445   : > { %v541_v13 = vsel %vm420_vm3, %v536_v12, 0 }
 0x446   : > { %1025 = vmatpush3.bf16.msra.mxu0 %v541_v13  ;;  %v531_v15 = vpack.c.bf16 %v530_v11, %v530_v11 }
 0x447   : > { %1036 = vmatprep.subr.bf16.mxu0 %v1129_v0 }
 0x449   : > { %1027 = vmatmul.mubr.msk.bf16.vlgmr.msra.gmra.mrb[4].mxu0 %vm404_vm2, %v531_v15 }
 0x44a   : > { %1037 = vmatpush3.bf16.msra.mxu0 %v651_v16  ;;  %1038 = vmatprep.mubr.msk.bf16.mxu0 %vm1130_vm0, %v1129_v0 }
 0x44b   : > { %v1102_v17 = vpop.eup %1101  ;;  %1048 = vmatprep.subr.bf16.mxu0 %v1129_v0 }
 0x44c   : > { %v643_v18 = vmul.f32 %v1102_v17, %v1096_v63 }
 0x44e   : > { %v644_v19 = vpack.c.bf16 %v643_v18, %v643_v18 }
 0x451   : > { %1039 = vmatmul.mubr.msk.bf16.vlgmr.msra.gmra.mrb[8].mxu0 %vm404_vm2, %v644_v19 }
 0x452   : > { %1050 = vmatprep.mubr.msk.bf16.mxu0 %vm1130_vm0, %v1129_v0 }
 0x46d   : > { %v751_v20 = vpop.xlane.xlu1 %750 }
 0x46e   : > { %1103 = vrcp.f32 %v751_v20 }
 0x471   : > { %v756_v21 = vpop.permute.xlu1 %755 }
 0x472   : > { %v761_v22 = vsel %vm420_vm3, %v756_v21, 0 }
 0x473   : > { %1049 = vmatpush3.bf16.msra.mxu0 %v761_v22 }
 0x478   : > { %v1104_v23 = vpop.eup %1103 }
 0x479   : > { %v753_v24 = vmul.f32 %v1104_v23, %v1098_v6 }
 0x47b   : > { %v754_v25 = vpack.c.bf16 %v753_v24, %v753_v24 }
 0x47d   : > { %1051 = vmatmul.mubr.msk.bf16.vlgmr.msra.gmra.mrb[12].mxu0 %vm404_vm2, %v754_v25 }
 0x51c   : > { %v577_v26 = vpop.f32.mrb[4].mxu0 }
 0x51d   : > { %804 = vrot.lane.b32.xlu0 %v577_v26, %s1133_s6  ;;  %v1028_v27 = vpop.f32.mrb[5].mxu0 }
 0x51e   : > { %v580_v28 = vpop.f32.mrb[6].mxu0 }
 0x51f   : > { %v1029_v29 = vpop.f32.mrb[7].mxu0 }
 0x524   : > { %v687_v30 = vpop.f32.mrb[8].mxu0 }
 0x525   : > { %808 = vrot.lane.b32.xlu1 %v687_v30, %s1132_s5  ;;  %v1040_v0 = vpop.f32.mrb[9].mxu0 }
 0x526   : > { %v690_v31 = vpop.f32.mrb[10].mxu0 }
 0x527   : > { %v1041_v32 = vpop.f32.mrb[11].mxu0 }
 0x550   : > { %v797_v34 = vpop.f32.mrb[12].mxu0 }
 0x551   : > { %812 = vrot.lane.b32.xlu0 %v797_v34, %s1131_s30  ;;  %v1052_v35 = vpop.f32.mrb[13].mxu0 }
 0x552   : > { %v800_v36 = vpop.f32.mrb[14].mxu0 }
 0x553   : > { %v1053_v37 = vpop.f32.mrb[15].mxu0 }
 0x58f   : > { %v805_v38 = vpop.permute.xlu0 %804 }
 0x590   : > { %v815_v40 = vsel %vm357_vm1, %v1240_v33, %v805_v38 }
 0x597   : > { %v809_v39 = vpop.permute.xlu1 %808 }
 0x598   : > { %v817_v41 = vsel %vm816_vm4, %v815_v40, %v809_v39 }
 0x5c3   : > { %v813_v42 = vpop.permute.xlu0 %812 }
 0x5c4   : > { %v819_v43 = vsel %vm818_vm5, %v817_v41, %v813_v42 }
 0x5c5   : > { %v820_v44 = vpack.c.bf16 %v819_v43, %v819_v43 }
 0x5c7   : > { %821 = vst [vmem:[%s345_s14] sm:$0xf] %v820_v44 }
 0x5c8 PF: > { %s14_s17 = sadd.s32 1, %s1127_s17   ;;  %s1291_s15 = smov %s1123_s16 }
 0x5c9   : > { %p11_p5 = scmp.ge.s32.totalorder %s14_s17, 4   ;;  %s1292_s16 = smov %s1294_s18 }
 0x5cb   :  { %13 = sbr.rel (!%p11_p5) target bundleno = 2 (0x2), region = 75 }

// kernel: bert_model_two.15
= control target key start
LH: loop header
LB: loop body
LE: loop exit
PB: predicated region body
PF: predicated region fallthrough
CT: control target
= control target key end

     0   :  { %v589_v1 = vmov 0   ;;  %v350_v34 = vlaneseq  ;;  %s780_s1 = inlined_call_operand.vmem [shape: bf16[128,512], index: 1, kind: input, shape index: {}]   ;;  %s781_s0 = inlined_call_operand.vmem [shape: bf16[16,128], index: 0, kind: input, shape index: {}]   ;;  %s782_s2 = inlined_call_operand.vmem [shape: f32[1,512], index: 2, kind: input, shape index: {}]   ;;  %s783_s3 = inlined_call_operand.vmem [shape: bf16[16,512], index: 3, kind: output, shape index: {}]  }
   0x1   :  { %v524_v0 = vld [vmem:[%s780_s1 + $0x4] ss:$16 sps:$4 sm:$0xff]   ;;  %267 = vmatprep.mubr.bf16.mxu0 %v589_v1  ;;  %310 = vmatprep.mubr.bf16.mxu1 %v589_v1  ;;  %v526_v2 = vld [vmem:[%s780_s1 + $0xc] ss:$16 sps:$4 sm:$0xff]   ;;  %v528_v3 = vld [vmem:[%s780_s1] ss:$16 sps:$4 sm:$0xff]  }
   0x2   :  { %235 = vmatprep.subr.bf16.mxu0 %v524_v0  ;;  %v529_v4 = vld [vmem:[%s780_s1 + $0x8] ss:$16 sps:$4 sm:$0xff]   ;;  %278 = vmatprep.subr.bf16.mxu1 %v526_v2  ;;  %v530_v5 = vld [vmem:[%s780_s1 + $0x24] ss:$16 sps:$4 sm:$0xff]   ;;  %v532_v6 = vld [vmem:[%s780_s1 + $0x2c] ss:$16 sps:$4 sm:$0xff]  }
   0x3   :  { %236 = vmatpush1.bf16.msra.mxu0 %v528_v3  ;;  %279 = vmatpush1.bf16.msra.mxu1 %v529_v4  ;;  %v534_v7 = vld [vmem:[%s780_s1 + $0x20] ss:$16 sps:$4 sm:$0xff]   ;;  %v535_v8 = vld [vmem:[%s780_s1 + $0x28] ss:$16 sps:$4 sm:$0xff]   ;;  %v536_v9 = vld [vmem:[%s780_s1 + $0x44] ss:$16 sps:$4 sm:$0xff]  }
   0x4   :  { %237 = vmatprep.subr.bf16.mxu0 %v530_v5  ;;  %280 = vmatprep.subr.bf16.mxu1 %v532_v6  ;;  %v538_v10 = vld [vmem:[%s780_s1 + $0x4c] ss:$16 sps:$4 sm:$0xff]   ;;  %v540_v11 = vld [vmem:[%s780_s1 + $0x40] ss:$16 sps:$4 sm:$0xff]   ;;  %v541_v12 = vld [vmem:[%s780_s1 + $0x48] ss:$16 sps:$4 sm:$0xff]  }
   0x5   :  { %v542_v13 = vld [vmem:[%s780_s1 + $0x64] ss:$16 sps:$4 sm:$0xff]   ;;  %v544_v14 = vld [vmem:[%s780_s1 + $0x6c] ss:$16 sps:$4 sm:$0xff]   ;;  %v546_v15 = vld [vmem:[%s780_s1 + $0x60] ss:$16 sps:$4 sm:$0xff]  }
   0x6   :  { %v547_v16 = vld [vmem:[%s780_s1 + $0x68] ss:$16 sps:$4 sm:$0xff]   ;;  %v548_v17 = vld [vmem:[%s780_s1 + $0x84] ss:$16 sps:$4 sm:$0xff]   ;;  %v550_v18 = vld [vmem:[%s780_s1 + $0x8c] ss:$16 sps:$4 sm:$0xff]  }
   0x7   :  { %238 = vmatpush1.bf16.msra.mxu0 %v534_v7  ;;  %281 = vmatpush1.bf16.msra.mxu1 %v535_v8  ;;  %v552_v19 = vld [vmem:[%s780_s1 + $0x80] ss:$16 sps:$4 sm:$0xff]   ;;  %v553_v20 = vld [vmem:[%s780_s1 + $0x88] ss:$16 sps:$4 sm:$0xff]   ;;  %v554_v21 = vld [vmem:[%s780_s1 + $0xa4] ss:$16 sps:$4 sm:$0xff]  }
   0x8   :  { %239 = vmatprep.subr.bf16.mxu0 %v536_v9  ;;  %282 = vmatprep.subr.bf16.mxu1 %v538_v10  ;;  %v556_v22 = vld [vmem:[%s780_s1 + $0xac] ss:$16 sps:$4 sm:$0xff]   ;;  %v558_v23 = vld [vmem:[%s780_s1 + $0xa0] ss:$16 sps:$4 sm:$0xff]   ;;  %v559_v24 = vld [vmem:[%s780_s1 + $0xa8] ss:$16 sps:$4 sm:$0xff]  }
   0x9   :  { %v560_v25 = vld [vmem:[%s780_s1 + $0xc4] ss:$16 sps:$4 sm:$0xff]   ;;  %v562_v26 = vld [vmem:[%s780_s1 + $0xcc] ss:$16 sps:$4 sm:$0xff]   ;;  %v564_v27 = vld [vmem:[%s780_s1 + $0xc0] ss:$16 sps:$4 sm:$0xff]  }
   0xa   :  { %v565_v28 = vld [vmem:[%s780_s1 + $0xc8] ss:$16 sps:$4 sm:$0xff]   ;;  %v566_v29 = vld [vmem:[%s780_s1 + $0xe4] ss:$16 sps:$4 sm:$0xff]   ;;  %v568_v30 = vld [vmem:[%s780_s1 + $0xec] ss:$16 sps:$4 sm:$0xff]  }
   0xb   :  { %240 = vmatpush1.bf16.msra.mxu0 %v540_v11  ;;  %283 = vmatpush1.bf16.msra.mxu1 %v541_v12  ;;  %v570_v31 = vld [vmem:[%s780_s1 + $0xe0] ss:$16 sps:$4 sm:$0xff]   ;;  %v571_v32 = vld [vmem:[%s780_s1 + $0xe8] ss:$16 sps:$4 sm:$0xff]   ;;  %v351_v35 = vshrl.u32 %v350_v34, 7 }
   0xc   :  { %241 = vmatprep.subr.bf16.mxu0 %v542_v13  ;;  %284 = vmatprep.subr.bf16.mxu1 %v544_v14  ;;  %v572_v33 = vld [vmem:[%s781_s0] sm:$0xff]  }
   0xd   :  { %v352_v36 = vsub.s32 0, %v351_v35  ;;  %v360_v37 = vsub.s32 2, %v351_v35  ;;  %v348_v38 = vld [vmem:[%s782_s2] sm:$0xf]  ;;  %v356_v39 = vsub.s32 1, %v351_v35  ;;  %v364_v40 = vsub.s32 3, %v351_v35 }
   0xf   :  { %242 = vmatpush1.bf16.msra.mxu0 %v546_v15  ;;  %285 = vmatpush1.bf16.msra.mxu1 %v547_v16  ;;  %v353_v41 = vrot.slane %v348_v38, %v352_v36  ;;  %v361_v42 = vrot.slane %v348_v38, %v360_v37  ;;  %v357_v43 = vrot.slane %v348_v38, %v356_v39 }
  0x10   :  { %243 = vmatprep.subr.bf16.mxu0 %v548_v17  ;;  %286 = vmatprep.subr.bf16.mxu1 %v550_v18  ;;  %v365_v44 = vrot.slane %v348_v38, %v364_v40 }
  0x13   :  { %244 = vmatpush1.bf16.msra.mxu0 %v552_v19  ;;  %287 = vmatpush1.bf16.msra.mxu1 %v553_v20 }
  0x14   :  { %245 = vmatprep.subr.bf16.mxu0 %v554_v21  ;;  %288 = vmatprep.subr.bf16.mxu1 %v556_v22 }
  0x17   :  { %246 = vmatpush1.bf16.msra.mxu0 %v558_v23  ;;  %289 = vmatpush1.bf16.msra.mxu1 %v559_v24 }
  0x18   :  { %247 = vmatprep.subr.bf16.mxu0 %v560_v25  ;;  %290 = vmatprep.subr.bf16.mxu1 %v562_v26 }
  0x1b   :  { %248 = vmatpush1.bf16.msra.mxu0 %v564_v27  ;;  %291 = vmatpush1.bf16.msra.mxu1 %v565_v28 }
  0x1c   :  { %249 = vmatprep.subr.bf16.mxu0 %v566_v29  ;;  %292 = vmatprep.subr.bf16.mxu1 %v568_v30 }
  0x1f   :  { %250 = vmatpush1.bf16.msra.mxu0 %v570_v31  ;;  %293 = vmatpush1.bf16.msra.mxu1 %v571_v32 }
  0x22   :  { %268 = vmatmul.mubr.bf16.vlgmr.msra.gmra.mrb[0].mxu0 %v572_v33  ;;  %311 = vmatmul.mubr.bf16.vlgmr.msra.gmra.mrb[0].mxu1 %v572_v33 }
  0xf5   :  { %v269_v45 = vpop.f32.mrb[0].mxu0  ;;  %v312_v46 = vpop.f32.mrb[0].mxu1 }
  0xf6   :  { %v712_v47 = vadd.f32 %v353_v41, %v269_v45  ;;  %v714_v48 = vadd.f32 %v361_v42, %v312_v46  ;;  %v271_v49 = vpop.f32.mrb[1].mxu0  ;;  %v314_v50 = vpop.f32.mrb[1].mxu1 }
  0xf7   :  { %v716_v51 = vadd.f32 %v357_v43, %v271_v49  ;;  %v718_v52 = vadd.f32 %v365_v44, %v314_v50  ;;  %v273_v53 = vpop.f32.mrb[2].mxu0  ;;  %v316_v54 = vpop.f32.mrb[2].mxu1 }
  0xf8   :  { %v386_v55 = vmul.f32 0.044715, %v712_v47  ;;  %v388_v56 = vmul.f32 0.044715, %v714_v48  ;;  %v726_v61 = vadd.f32 %v353_v41, %v273_v53  ;;  %v728_v62 = vadd.f32 %v361_v42, %v316_v54  ;;  %v275_v63 = vpop.f32.mrb[3].mxu0  ;;  %v318_v0 = vpop.f32.mrb[3].mxu1 }
  0xf9   :  { %v387_v57 = vmul.f32 0.044715, %v716_v51  ;;  %v389_v58 = vmul.f32 0.044715, %v718_v52  ;;  %v732_v3 = vadd.f32 %v357_v43, %v275_v63  ;;  %v743_v13 = vadd.f32 %v365_v44, %v318_v0 }
  0xfa   :  { %v394_v59 = vmul.f32 %v386_v55, %v712_v47  ;;  %v396_v60 = vmul.f32 %v388_v56, %v714_v48  ;;  %v390_v6 = vmul.f32 0.044715, %v726_v61  ;;  %v392_v9 = vmul.f32 0.044715, %v728_v62 }
  0xfb   :  { %v395_v1 = vmul.f32 %v387_v57, %v716_v51  ;;  %v397_v2 = vmul.f32 %v389_v58, %v718_v52  ;;  %v391_v17 = vmul.f32 0.044715, %v732_v3  ;;  %v393_v26 = vmul.f32 0.044715, %v743_v13 }
  0xfc   :  { %v402_v4 = vmul.f32 %v394_v59, %v712_v47  ;;  %v404_v5 = vmul.f32 %v396_v60, %v714_v48  ;;  %v398_v12 = vmul.f32 %v390_v6, %v726_v61  ;;  %v400_v16 = vmul.f32 %v392_v9, %v728_v62 }
  0xfd   :  { %v403_v7 = vmul.f32 %v395_v1, %v716_v51  ;;  %v405_v8 = vmul.f32 %v397_v2, %v718_v52  ;;  %v399_v24 = vmul.f32 %v391_v17, %v732_v3  ;;  %v401_v30 = vmul.f32 %v393_v26, %v743_v13 }
  0xfe   :  { %v410_v10 = vadd.f32 %v402_v4, %v712_v47  ;;  %v412_v11 = vadd.f32 %v404_v5, %v714_v48  ;;  %v406_v20 = vmul.f32 %v398_v12, %v726_v61  ;;  %v408_v23 = vmul.f32 %v400_v16, %v728_v62 }
  0xff   :  { %v411_v14 = vadd.f32 %v403_v7, %v716_v51  ;;  %v413_v15 = vadd.f32 %v405_v8, %v718_v52  ;;  %v407_v28 = vmul.f32 %v399_v24, %v732_v3  ;;  %v409_v33 = vmul.f32 %v401_v30, %v743_v13 }
 0x100   :  { %v418_v18 = vmul.f32 0.7978846, %v410_v10  ;;  %v420_v19 = vmul.f32 0.7978846, %v412_v11  ;;  %v414_v25 = vadd.f32 %v406_v20, %v726_v61  ;;  %v416_v27 = vadd.f32 %v408_v23, %v728_v62 }
 0x101   :  { %v419_v21 = vmul.f32 0.7978846, %v411_v14  ;;  %v421_v22 = vmul.f32 0.7978846, %v413_v15  ;;  %v415_v32 = vadd.f32 %v407_v28, %v732_v3  ;;  %v417_v35 = vadd.f32 %v409_v33, %v743_v13 }
 0x102   :  { %573 = vtanh.f32 %v418_v18  ;;  %v422_v29 = vmul.f32 0.7978846, %v414_v25  ;;  %v424_v31 = vmul.f32 0.7978846, %v416_v27  ;;  %v378_v39 = vmul.f32 0.5, %v712_v47 }
 0x103   :  { %575 = vtanh.f32 %v420_v19  ;;  %v423_v34 = vmul.f32 0.7978846, %v415_v32  ;;  %v425_v36 = vmul.f32 0.7978846, %v417_v35  ;;  %v380_v42 = vmul.f32 0.5, %v714_v48 }
 0x104   :  { %577 = vtanh.f32 %v419_v21  ;;  %v379_v46 = vmul.f32 0.5, %v716_v51  ;;  %v381_v54 = vmul.f32 0.5, %v718_v52  ;;  %v382_v47 = vmul.f32 0.5, %v726_v61 }
 0x105   :  { %579 = vtanh.f32 %v421_v22  ;;  %v383_v2 = vmul.f32 0.5, %v732_v3  ;;  %v384_v52 = vmul.f32 0.5, %v728_v62  ;;  %v385_v6 = vmul.f32 0.5, %v743_v13 }
 0x106   :  { %581 = vtanh.f32 %v422_v29 }
 0x107   :  { %583 = vtanh.f32 %v424_v31 }
 0x108   :  { %585 = vtanh.f32 %v423_v34 }
 0x109   :  { %587 = vtanh.f32 %v425_v36 }
 0x10c   :  { %v574_v37 = vpop.eup %573 }
 0x10d   :  { %v576_v38 = vpop.eup %575  ;;  %v434_v40 = vadd.f32 1.0, %v574_v37 }
 0x10e   :  { %v578_v41 = vpop.eup %577  ;;  %v436_v43 = vadd.f32 1.0, %v576_v38 }
 0x10f   :  { %v580_v44 = vpop.eup %579  ;;  %v442_v45 = vmul.f32 %v434_v40, %v378_v39  ;;  %v435_v49 = vadd.f32 1.0, %v578_v41 }
 0x110   :  { %v582_v50 = vpop.eup %581  ;;  %v444_v53 = vmul.f32 %v436_v43, %v380_v42  ;;  %v437_v55 = vadd.f32 1.0, %v580_v44 }
 0x111   :  { %v584_v56 = vpop.eup %583  ;;  %v443_v57 = vmul.f32 %v435_v49, %v379_v46  ;;  %v438_v58 = vadd.f32 1.0, %v582_v50 }
 0x112   :  { %v445_v59 = vmul.f32 %v437_v55, %v381_v54  ;;  %v586_v60 = vpop.eup %585  ;;  %v440_v48 = vadd.f32 1.0, %v584_v56 }
 0x113   :  { %v519_v63 = vpack.c.bf16 %v443_v57, %v442_v45  ;;  %v446_v1 = vmul.f32 %v438_v58, %v382_v47  ;;  %v439_v51 = vadd.f32 1.0, %v586_v60  ;;  %v588_v4 = vpop.eup %587 }
 0x114   :  { %v520_v0 = vpack.c.bf16 %v445_v59, %v444_v53  ;;  %v448_v5 = vmul.f32 %v440_v48, %v384_v52  ;;  %v441_v7 = vadd.f32 1.0, %v588_v4 }
 0x115   :  { %474 = vst [vmem:[%s783_s3] sm:$0xff] %v519_v63  ;;  %v447_v61 = vmul.f32 %v439_v51, %v383_v2 }
 0x116   :  { %475 = vst [vmem:[%s783_s3 + $0x8] sm:$0xff] %v520_v0  ;;  %v449_v9 = vmul.f32 %v441_v7, %v385_v6 }
 0x117   :  { %v521_v8 = vpack.c.bf16 %v447_v61, %v446_v1 }
 0x118   :  { %v522_v3 = vpack.c.bf16 %v449_v9, %v448_v5 }
 0x119   :  { %476 = vst [vmem:[%s783_s3 + $0x10] sm:$0xff] %v521_v8 }
 0x11a   :  { %477 = vst [vmem:[%s783_s3 + $0x18] sm:$0xff] %v522_v3 }

// kernel: bert_model_two.16
= control target key start
LH: loop header
LB: loop body
LE: loop exit
PB: predicated region body
PF: predicated region fallthrough
CT: control target
= control target key end

     0   :  { %s769_s1 = inlined_call_operand.vmem [shape: bf16[512,128], index: 1, kind: input, shape index: {}]   ;;  %s770_s0 = inlined_call_operand.vmem [shape: bf16[16,512], index: 0, kind: input, shape index: {}]   ;;  %s771_s3 = inlined_call_operand.vmem [shape: bf16[16,128], index: 3, kind: input, shape index: {}]   ;;  %s772_s2 = inlined_call_operand.vmem [shape: f32[1,128], index: 2, kind: input, shape index: {}]   ;;  %s773_s4 = inlined_call_operand.vmem [shape: f32[1,128], index: 4, kind: input, shape index: {}]   ;;  %s774_s5 = inlined_call_operand.vmem [shape: f32[1,128], index: 5, kind: input, shape index: {}]   ;;  %s775_s6 = inlined_call_operand.vmem [shape: bf16[16,128], index: 6, kind: output, shape index: {}]  }
   0x1   :  { %v569_v0 = vld [vmem:[%s769_s1 + $0x40] sm:$0xff]   ;;  %v573_v4 = vld [vmem:[%s769_s1 + $0x48] sm:$0xff]   ;;  %v577_v8 = vld [vmem:[%s769_s1 + $0x50] sm:$0xff]  }
   0x2   :  { %v570_v1 = vld [vmem:[%s769_s1 + $0xc0] sm:$0xff]   ;;  %525 = vmatprep.subr.bf16.mxu0 %v569_v0  ;;  %v574_v5 = vld [vmem:[%s769_s1 + $0xc8] sm:$0xff]   ;;  %v578_v9 = vld [vmem:[%s769_s1 + $0xd0] sm:$0xff]  }
   0x3   :  { %v571_v2 = vld [vmem:[%s769_s1] sm:$0xff]   ;;  %547 = vmatprep.subr.bf16.mxu1 %v570_v1  ;;  %v575_v6 = vld [vmem:[%s769_s1 + $0x8] sm:$0xff]   ;;  %v579_v10 = vld [vmem:[%s769_s1 + $0x10] sm:$0xff]  }
   0x4   :  { %v572_v3 = vld [vmem:[%s769_s1 + $0x80] sm:$0xff]   ;;  %526 = vmatpush3.bf16.msra.mxu0 %v571_v2  ;;  %v576_v7 = vld [vmem:[%s769_s1 + $0x88] sm:$0xff]   ;;  %v580_v11 = vld [vmem:[%s769_s1 + $0x90] sm:$0xff]  }
   0x5   :  { %548 = vmatpush3.bf16.msra.mxu1 %v572_v3  ;;  %527 = vmatprep.subr.bf16.mxu0 %v573_v4  ;;  %v581_v12 = vld [vmem:[%s769_s1 + $0x58] sm:$0xff]   ;;  %v585_v16 = vld [vmem:[%s769_s1 + $0x60] sm:$0xff]   ;;  %v589_v20 = vld [vmem:[%s769_s1 + $0x68] sm:$0xff]  }
   0x6   :  { %549 = vmatprep.subr.bf16.mxu1 %v574_v5  ;;  %v582_v13 = vld [vmem:[%s769_s1 + $0xd8] sm:$0xff]   ;;  %v586_v17 = vld [vmem:[%s769_s1 + $0xe0] sm:$0xff]   ;;  %v590_v21 = vld [vmem:[%s769_s1 + $0xe8] sm:$0xff]  }
   0x7   :  { %v583_v14 = vld [vmem:[%s769_s1 + $0x18] sm:$0xff]   ;;  %v587_v18 = vld [vmem:[%s769_s1 + $0x20] sm:$0xff]   ;;  %v591_v22 = vld [vmem:[%s769_s1 + $0x28] sm:$0xff]  }
   0x8   :  { %528 = vmatpush3.bf16.msra.mxu0 %v575_v6  ;;  %v584_v15 = vld [vmem:[%s769_s1 + $0x98] sm:$0xff]   ;;  %v588_v19 = vld [vmem:[%s769_s1 + $0xa0] sm:$0xff]   ;;  %v592_v23 = vld [vmem:[%s769_s1 + $0xa8] sm:$0xff]  }
   0x9   :  { %550 = vmatpush3.bf16.msra.mxu1 %v576_v7  ;;  %529 = vmatprep.subr.bf16.mxu0 %v577_v8  ;;  %v593_v24 = vld [vmem:[%s769_s1 + $0x70] sm:$0xff]   ;;  %v597_v28 = vld [vmem:[%s769_s1 + $0x78] sm:$0xff]   ;;  %v517_v42 = vld [vmem:[%s771_s3] sm:$0xff]  }
   0xa   :  { %551 = vmatprep.subr.bf16.mxu1 %v578_v9  ;;  %v594_v25 = vld [vmem:[%s769_s1 + $0xf0] sm:$0xff]   ;;  %v598_v29 = vld [vmem:[%s769_s1 + $0xf8] sm:$0xff]   ;;  %v509_v48 = vld [vmem:[%s772_s2] ss:$0 sm:$0xff]  ;;  %v518_v51 = vunpack.c.l.bf16 %v517_v42  ;;  %v519_v56 = vunpack.c.h.bf16 %v517_v42 }
   0xb   :  { %v595_v26 = vld [vmem:[%s769_s1 + $0x30] sm:$0xff]   ;;  %v599_v30 = vld [vmem:[%s769_s1 + $0x38] sm:$0xff]  }
   0xc   :  { %530 = vmatpush3.bf16.msra.mxu0 %v579_v10  ;;  %v596_v27 = vld [vmem:[%s769_s1 + $0xb0] sm:$0xff]   ;;  %v600_v31 = vld [vmem:[%s769_s1 + $0xb8] sm:$0xff]   ;;  %v510_v10 = vld [vmem:[%s773_s4] ss:$0 sm:$0xff] }
   0xd   :  { %552 = vmatpush3.bf16.msra.mxu1 %v580_v11  ;;  %531 = vmatprep.subr.bf16.mxu0 %v581_v12  ;;  %v601_v32 = vld [vmem:[%s770_s0] ss:$16 sps:$4 sm:$0xff]   ;;  %v603_v33 = vld [vmem:[%s770_s0 + $0x4] ss:$16 sps:$4 sm:$0xff]   ;;  %v604_v34 = vld [vmem:[%s770_s0 + $0x8] ss:$16 sps:$4 sm:$0xff]  }
   0xe   :  { %553 = vmatprep.subr.bf16.mxu1 %v582_v13  ;;  %v606_v35 = vld [vmem:[%s770_s0 + $0xc] ss:$16 sps:$4 sm:$0xff]   ;;  %344 = vmatprep.mubr.bf16.mxu0 %v603_v33 }
   0xf   :  { %385 = vmatprep.mubr.bf16.mxu1 %v606_v35 }
  0x10   :  { %532 = vmatpush3.bf16.msra.mxu0 %v583_v14  ;;  %v511_v14 = vld [vmem:[%s774_s5] ss:$0 sm:$0xff] }
  0x11   :  { %554 = vmatpush3.bf16.msra.mxu1 %v584_v15  ;;  %533 = vmatprep.subr.bf16.mxu0 %v585_v16 }
  0x12   :  { %555 = vmatprep.subr.bf16.mxu1 %v586_v17 }
  0x14   :  { %534 = vmatpush3.bf16.msra.mxu0 %v587_v18 }
  0x15   :  { %556 = vmatpush3.bf16.msra.mxu1 %v588_v19  ;;  %535 = vmatprep.subr.bf16.mxu0 %v589_v20 }
  0x16   :  { %557 = vmatprep.subr.bf16.mxu1 %v590_v21 }
  0x18   :  { %536 = vmatpush3.bf16.msra.mxu0 %v591_v22 }
  0x19   :  { %558 = vmatpush3.bf16.msra.mxu1 %v592_v23  ;;  %537 = vmatprep.subr.bf16.mxu0 %v593_v24 }
  0x1a   :  { %559 = vmatprep.subr.bf16.mxu1 %v594_v25 }
  0x1c   :  { %538 = vmatpush3.bf16.msra.mxu0 %v595_v26 }
  0x1d   :  { %560 = vmatpush3.bf16.msra.mxu1 %v596_v27  ;;  %539 = vmatprep.subr.bf16.mxu0 %v597_v28 }
  0x1e   :  { %561 = vmatprep.subr.bf16.mxu1 %v598_v29 }
  0x20   :  { %540 = vmatpush3.bf16.msra.mxu0 %v599_v30 }
  0x21   :  { %562 = vmatpush3.bf16.msra.mxu1 %v600_v31 }
  0x23   :  { %345 = vmatmul.mubr.bf16.vlgmr.msra.gmra.mrb[0].mxu0 %v601_v32 }
  0x24   :  { %386 = vmatmul.mubr.bf16.vlgmr.msra.gmra.mrb[0].mxu1 %v604_v34 }
  0xf6   :  { %v541_v36 = vpop.f32.mrb[0].mxu0 }
  0xf7   :  { %v563_v37 = vpop.f32.mrb[0].mxu1  ;;  %v542_v38 = vpop.f32.mrb[1].mxu0 }
  0xf8   :  { %v543_v39 = vadd.f32 %v542_v38, %v541_v36  ;;  %v564_v40 = vpop.f32.mrb[1].mxu1  ;;  %v544_v41 = vpop.f32.mrb[2].mxu0 }
  0xf9   :  { %v565_v43 = vadd.f32 %v564_v40, %v563_v37  ;;  %v566_v44 = vpop.f32.mrb[2].mxu1  ;;  %v545_v45 = vpop.f32.mrb[3].mxu0 }
  0xfa   :  { %v546_v46 = vadd.f32 %v545_v45, %v544_v41  ;;  %v567_v47 = vpop.f32.mrb[3].mxu1 }
  0xfb   :  { %v388_v49 = vadd.f32 %v565_v43, %v543_v39  ;;  %v568_v50 = vadd.f32 %v567_v47, %v566_v44 }
  0xfd   :  { %v391_v52 = vadd.f32 %v568_v50, %v546_v46  ;;  %v410_v53 = vadd.f32 %v509_v48, %v388_v49 }
  0xff   :  { %v416_v54 = vadd.f32 %v518_v51, %v410_v53  ;;  %v411_v55 = vadd.f32 %v509_v48, %v391_v52 }
 0x101   :  { %418 = vadd.xlane.f32.xlu0 %v416_v54  ;;  %v417_v57 = vadd.f32 %v519_v56, %v411_v55 }
 0x105   :  { %420 = vadd.xlane.f32.xlu0 %v417_v57 }
 0x18e   :  { %v419_v58 = vpop.xlane.xlu0 %418 }
 0x18f   :  { %v423_v59 = vmul.f32 0.0078125, %v419_v58 }
 0x191   :  { %v425_v60 = vsub.f32 %v416_v54, %v423_v59 }
 0x192   :  { %v421_v61 = vpop.xlane.xlu0 %420 }
 0x193   :  { %v424_v62 = vmul.f32 0.0078125, %v421_v61  ;;  %v427_v63 = vmul.f32 %v425_v60, %v425_v60 }
 0x195   :  { %v426_v0 = vsub.f32 %v417_v57, %v424_v62  ;;  %429 = vadd.xlane.f32.xlu1 %v427_v63 }
 0x197   :  { %v428_v1 = vmul.f32 %v426_v0, %v426_v0 }
 0x199   :  { %431 = vadd.xlane.f32.xlu1 %v428_v1 }
 0x222   :  { %v430_v2 = vpop.xlane.xlu1 %429 }
 0x223   :  { %v433_v3 = vmul.f32 0.0078125, %v430_v2 }
 0x225   :  { %v435_v4 = vadd.f32 1e-12, %v433_v3 }
 0x226   :  { %v432_v5 = vpop.xlane.xlu1 %431 }
 0x227   :  { %607 = vrsqrt.f32 %v435_v4  ;;  %v434_v6 = vmul.f32 0.0078125, %v432_v5 }
 0x229   :  { %v436_v7 = vadd.f32 1e-12, %v434_v6 }
 0x22b   :  { %609 = vrsqrt.f32 %v436_v7 }
 0x231   :  { %v608_v8 = vpop.eup %607 }
 0x232   :  { %v439_v9 = vmul.f32 %v608_v8, %v425_v60 }
 0x234   :  { %v448_v12 = vmul.f32 %v510_v10, %v439_v9 }
 0x235   :  { %v610_v11 = vpop.eup %609 }
 0x236   :  { %v440_v13 = vmul.f32 %v610_v11, %v426_v0  ;;  %v457_v16 = vadd.f32 %v511_v14, %v448_v12 }
 0x238   :  { %v449_v15 = vmul.f32 %v510_v10, %v440_v13 }
 0x23a   :  { %v458_v17 = vadd.f32 %v511_v14, %v449_v15 }
 0x23c   :  { %v523_v18 = vpack.c.bf16 %v458_v17, %v457_v16 }
 0x23e   :  { %524 = vst [vmem:[%s775_s6] sm:$0xff] %v523_v18  }

</bundles_post_ra>
